<compile_context>
chip_gen: v7x
topology: tpu7x:2x2x1
jax: 0.10.0
libtpu: 0.0.40
codegen_flags: <defaults>
</compile_context>

<pallas_src>
import functools
import math

import jax
import jax.numpy as jnp
from jax.experimental import pallas as pl
from jax.experimental.pallas import tpu as pltpu


def _layer_norm(x, gamma, beta, eps=1e-5):
    mean = jnp.mean(x, axis=-1, keepdims=True)
    var = jnp.mean((x - mean) ** 2, axis=-1, keepdims=True)
    return (x - mean) * jax.lax.rsqrt(var + eps) * gamma + beta


def bert_stack_kernel(num_heads,
                      x_ref, bias_ref,
                      wq_ref, bq_ref, wk_ref, bk_ref, wv_ref, bv_ref,
                      wo_ref, bo_ref, g1_ref, be1_ref,
                      w1_ref, b1_ref, w2_ref, b2_ref, g2_ref, be2_ref,
                      out_ref):
    layer = pl.program_id(0)

    # Seed the VMEM-resident activation buffer at layer 0.  out_ref's block
    # index is constant across the layer axis, so it acts as an accumulator and
    # is only written back to HBM once at the end of the grid.
    @pl.when(layer == 0)
    def _():
        out_ref[...] = x_ref[...]

    x = out_ref[...]                        # (B*S, H) f32, resident across layers
    BS, H = x.shape
    dh = H // num_heads
    scale = 1.0 / math.sqrt(dh)

    # ---- multi-head self-attention (bf16 MXU operands, f32 accumulate) ------
    xb = x.astype(jnp.bfloat16)
    q = jnp.dot(xb, wq_ref[0], preferred_element_type=jnp.float32) + bq_ref[0]
    k = jnp.dot(xb, wk_ref[0], preferred_element_type=jnp.float32) + bk_ref[0]
    v = jnp.dot(xb, wv_ref[0], preferred_element_type=jnp.float32) + bv_ref[0]

    bias = bias_ref[...]                    # (B*S, B*S): 0 = keep, -1e6 = masked

    attn = jnp.zeros((BS, H), jnp.float32)
    for h in range(num_heads):              # static unroll; heads are lane-contiguous slices
        lo, hi = h * dh, (h + 1) * dh
        qh = q[:, lo:hi].astype(jnp.bfloat16)
        kh = k[:, lo:hi].astype(jnp.bfloat16)
        vh = v[:, lo:hi].astype(jnp.bfloat16)
        # scores over the whole (B*S) slab; batch separation + valid_lens come
        # from the additive bias (no per-batch grid step, no where-select).
        s = jax.lax.dot_general(qh, kh, (((1,), (1,)), ((), ())),
                                preferred_element_type=jnp.float32)
        s = s * scale + bias
        s = s - jnp.max(s, axis=-1, keepdims=True)
        p = jnp.exp(s)                      # f32 softmax (safe for v5e, keeps -1e6 fill exact)
        p = p * pl.reciprocal(jnp.sum(p, axis=-1, keepdims=True), approx=True)
        oh = jnp.dot(p.astype(jnp.bfloat16), vh, preferred_element_type=jnp.float32)
        # Fold the output projection per head: sum_h oh @ wo[h*dh:(h+1)*dh, :]
        # avoids a lane-axis concatenate entirely.
        attn = attn + jnp.dot(oh.astype(jnp.bfloat16), wo_ref[0, lo:hi, :],
                              preferred_element_type=jnp.float32)
    attn = attn + bo_ref[0]

    # ---- AddNorm 1 (f32) -----------------------------------------------------
    y = _layer_norm(x + attn, g1_ref[0], be1_ref[0])

    # ---- position-wise FFN (bf16 MXU operands) --------------------------------
    h1 = jnp.dot(y.astype(jnp.bfloat16), w1_ref[0],
                 preferred_element_type=jnp.float32) + b1_ref[0]
    h1 = jnp.maximum(h1, 0.0)
    f = jnp.dot(h1.astype(jnp.bfloat16), w2_ref[0],
                preferred_element_type=jnp.float32) + b2_ref[0]

    # ---- AddNorm 2: write resident activations for the next layer ------------
    out_ref[...] = _layer_norm(y + f, g2_ref[0], be2_ref[0])


def bert_encoder_stack(x_flat, attn_bias, blocks, num_heads):
    """Run all encoder layers in one pallas_call. x_flat: (B*S, H) f32."""
    L = blocks["wq"].shape[0]
    BS, H = x_flat.shape
    F = blocks["w1"].shape[-1]
    bf = jnp.bfloat16

    def const(shape):
        return pl.BlockSpec(shape, lambda l: (0,) * len(shape))

    def per_layer(shape):
        return pl.BlockSpec((1,) + shape, lambda l: (l,) + (0,) * len(shape))

    in_specs = [
        const((BS, H)),                             # x (resident)
        const((BS, BS)),                            # additive attention bias (resident)
        per_layer((H, H)), per_layer((1, H)),       # wq, bq
        per_layer((H, H)), per_layer((1, H)),       # wk, bk
        per_layer((H, H)), per_layer((1, H)),       # wv, bv
        per_layer((H, H)), per_layer((1, H)),       # wo, bo
        per_layer((1, H)), per_layer((1, H)),       # gamma1, beta1
        per_layer((H, F)), per_layer((1, F)),       # w1, b1
        per_layer((F, H)), per_layer((1, H)),       # w2, b2
        per_layer((1, H)), per_layer((1, H)),       # gamma2, beta2
    ]

    num_heads_i = int(num_heads)
    flops = L * (8 * BS * H * H + 4 * BS * BS * H + 4 * BS * H * F)
    transcendentals = L * (num_heads_i * BS * BS + 3 * BS)
    bytes_accessed = (2 * BS * H * 4 + BS * BS * 4
                      + L * ((4 * H * H + 2 * H * F) * 2 + (8 * H + F) * 4))

    return pl.pallas_call(
        functools.partial(bert_stack_kernel, num_heads_i),
        out_shape=jax.ShapeDtypeStruct((BS, H), jnp.float32),
        grid_spec=pltpu.PrefetchScalarGridSpec(
            num_scalar_prefetch=0,
            grid=(L,),                              # layers are sequential
            in_specs=in_specs,
            out_specs=pl.BlockSpec((BS, H), lambda l: (0, 0)),
        ),
        compiler_params=pltpu.CompilerParams(
            dimension_semantics=("arbitrary",)),    # layer l+1 depends on layer l
        cost_estimate=pl.CostEstimate(flops=flops,
                                      transcendentals=transcendentals,
                                      bytes_accessed=bytes_accessed),
    )(x_flat, attn_bias,
      blocks["wq"].astype(bf), blocks["bq"],
      blocks["wk"].astype(bf), blocks["bk"],
      blocks["wv"].astype(bf), blocks["bv"],
      blocks["wo"].astype(bf), blocks["bo"],
      blocks["gamma1"], blocks["beta1"],
      blocks["w1"].astype(bf), blocks["b1"],
      blocks["w2"].astype(bf), blocks["b2"],
      blocks["gamma2"], blocks["beta2"])


def make_attn_bias(valid_lens, B, S):
    """Additive mask over the flattened (B*S, B*S) score matrix.

    keep[i, j] = (i, j in same batch row) and (j's position < valid_lens[batch(i)])
    Matches d2l masked_softmax semantics (1-D valid_lens, -1e6 fill)."""
    rows = jnp.arange(B * S, dtype=jnp.int32)
    cols = jnp.arange(B * S, dtype=jnp.int32)
    row_b = rows // S
    col_b = cols // S
    col_in = cols % S
    same_batch = row_b[:, None] == col_b[None, :]
    within = col_in[None, :] < valid_lens[row_b][:, None]
    keep = jnp.logical_and(same_batch, within)
    return jnp.where(keep, 0.0, -1e6).astype(jnp.float32)


def bert_encoder_forward(params, tokens, segments, valid_lens, num_heads):
    # Embedding lookups are gather glue (plain JAX); compute-heavy path is Pallas.
    X = (jnp.take(params["token_embedding"], tokens, axis=0)
         + jnp.take(params["segment_embedding"], segments, axis=0))
    X = X + params["pos_embedding"][:, :X.shape[1], :]
    B, S, H = X.shape
    bias = make_attn_bias(valid_lens, B, S)
    out = bert_encoder_stack(X.reshape(B * S, H), bias, params["blocks"], num_heads)
    return out.reshape(B, S, H)


def init_params(key, vocab_size, H, F, num_layers, max_len):
    keys = jax.random.split(key, 4)
    kq, kk, kv, ko, k1, k2 = jax.random.split(keys[3], 6)
    L = num_layers
    return {
        "token_embedding": 0.02 * jax.random.normal(keys[0], (vocab_size, H), jnp.float32),
        "segment_embedding": 0.02 * jax.random.normal(keys[1], (2, H), jnp.float32),
        "pos_embedding": jax.random.normal(keys[2], (1, max_len, H), jnp.float32),
        # Per-layer params stacked along a leading L axis so one pallas_call
        # runs the whole stack and pipelines weight DMA across layers.
        "blocks": {
            "wq": 0.02 * jax.random.normal(kq, (L, H, H), jnp.float32),
            "bq": jnp.zeros((L, 1, H), jnp.float32),
            "wk": 0.02 * jax.random.normal(kk, (L, H, H), jnp.float32),
            "bk": jnp.zeros((L, 1, H), jnp.float32),
            "wv": 0.02 * jax.random.normal(kv, (L, H, H), jnp.float32),
            "bv": jnp.zeros((L, 1, H), jnp.float32),
            "wo": 0.02 * jax.random.normal(ko, (L, H, H), jnp.float32),
            "bo": jnp.zeros((L, 1, H), jnp.float32),
            "gamma1": jnp.ones((L, 1, H), jnp.float32),
            "beta1": jnp.zeros((L, 1, H), jnp.float32),
            "w1": 0.02 * jax.random.normal(k1, (L, H, F), jnp.float32),
            "b1": jnp.zeros((L, 1, F), jnp.float32),
            "w2": 0.02 * jax.random.normal(k2, (L, F, H), jnp.float32),
            "b2": jnp.zeros((L, 1, H), jnp.float32),
            "gamma2": jnp.ones((L, 1, H), jnp.float32),
            "beta2": jnp.zeros((L, 1, H), jnp.float32),
        },
    }


if __name__ == "__main__":
    vocab_size = 100
    num_hiddens = 32          # norm_shape = [32]
    ffn_num_hiddens = 64
    num_heads = 2
    num_layers = 2
    max_len = 64
    # dropout is inactive at inference; TODO(synk): training-mode dropout not implemented.

    key = jax.random.PRNGKey(0)
    k_tok, k_par = jax.random.split(key)

    tokens = jax.random.randint(k_tok, (2, 8), 0, vocab_size, dtype=jnp.int32)
    segments = jnp.array([[0, 0, 0, 0, 1, 1, 1, 1],
                          [0, 0, 0, 1, 1, 1, 1, 1]], dtype=jnp.int32)
    valid_lens = jnp.array([8, 6], dtype=jnp.int32)

    params = init_params(k_par, vocab_size, num_hiddens, ffn_num_hiddens,
                         num_layers, max_len)

    out = bert_encoder_forward(params, tokens, segments, valid_lens, num_heads)
    out = jax.block_until_ready(out)
    assert out.shape == (2, 8, num_hiddens)
    print("KERNEL_OK")
</pallas_src>

<mosaic_0001>
module attributes {stable_mosaic.version = 11 : i64} {
  func.func @bert_stack_kernel(%arg0: i32, %arg1: memref<16x32xf32, #tpu.memory_space<vmem>>, %arg2: memref<16x16xf32, #tpu.memory_space<vmem>>, %arg3: memref<1x32x32xbf16, #tpu.memory_space<vmem>>, %arg4: memref<1x1x32xf32, #tpu.memory_space<vmem>>, %arg5: memref<1x32x32xbf16, #tpu.memory_space<vmem>>, %arg6: memref<1x1x32xf32, #tpu.memory_space<vmem>>, %arg7: memref<1x32x32xbf16, #tpu.memory_space<vmem>>, %arg8: memref<1x1x32xf32, #tpu.memory_space<vmem>>, %arg9: memref<1x32x32xbf16, #tpu.memory_space<vmem>>, %arg10: memref<1x1x32xf32, #tpu.memory_space<vmem>>, %arg11: memref<1x1x32xf32, #tpu.memory_space<vmem>>, %arg12: memref<1x1x32xf32, #tpu.memory_space<vmem>>, %arg13: memref<1x32x64xbf16, #tpu.memory_space<vmem>>, %arg14: memref<1x1x64xf32, #tpu.memory_space<vmem>>, %arg15: memref<1x64x32xbf16, #tpu.memory_space<vmem>>, %arg16: memref<1x1x32xf32, #tpu.memory_space<vmem>>, %arg17: memref<1x1x32xf32, #tpu.memory_space<vmem>>, %arg18: memref<1x1x32xf32, #tpu.memory_space<vmem>>, %arg19: memref<16x32xf32, #tpu.memory_space<vmem>>) attributes {dimension_semantics = [#tpu.dimension_semantics<arbitrary>], iteration_bounds = array<i64: 2>, scalar_prefetch = 0 : i64, scratch_operands = 0 : i64, tpu.core_type = #tpu.core_type<tc>, window_params = [{pipeline_mode = #tpu.pipeline_mode<synchronous>, transform_indices = @transform_0, window_bounds = array<i64: 16, 32>}, {pipeline_mode = #tpu.pipeline_mode<synchronous>, transform_indices = @transform_1, window_bounds = array<i64: 16, 16>}, {transform_indices = @transform_2, window_bounds = array<i64: 1, 32, 32>}, {transform_indices = @transform_3, window_bounds = array<i64: 1, 1, 32>}, {transform_indices = @transform_4, window_bounds = array<i64: 1, 32, 32>}, {transform_indices = @transform_5, window_bounds = array<i64: 1, 1, 32>}, {transform_indices = @transform_6, window_bounds = array<i64: 1, 32, 32>}, {transform_indices = @transform_7, window_bounds = array<i64: 1, 1, 32>}, {transform_indices = @transform_8, window_bounds = array<i64: 1, 32, 32>}, {transform_indices = @transform_9, window_bounds = array<i64: 1, 1, 32>}, {transform_indices = @transform_10, window_bounds = array<i64: 1, 1, 32>}, {transform_indices = @transform_11, window_bounds = array<i64: 1, 1, 32>}, {transform_indices = @transform_12, window_bounds = array<i64: 1, 32, 64>}, {transform_indices = @transform_13, window_bounds = array<i64: 1, 1, 64>}, {transform_indices = @transform_14, window_bounds = array<i64: 1, 64, 32>}, {transform_indices = @transform_15, window_bounds = array<i64: 1, 1, 32>}, {transform_indices = @transform_16, window_bounds = array<i64: 1, 1, 32>}, {transform_indices = @transform_17, window_bounds = array<i64: 1, 1, 32>}, {pipeline_mode = #tpu.pipeline_mode<synchronous>, transform_indices = @transform_18, window_bounds = array<i64: 16, 32>}]} {
    %c0_i32 = arith.constant 0 : i32
    %0 = arith.cmpi eq, %arg0, %c0_i32 : i32
    %1 = arith.extui %0 : i1 to i32
    %c0_i32_0 = arith.constant 0 : i32
    %2 = arith.cmpi ne, %1, %c0_i32_0 : i32
    scf.if %2 {
      %c0_84 = arith.constant 0 : index
      %c0_85 = arith.constant 0 : index
      %159 = vector.load %arg1[%c0_84, %c0_85] : memref<16x32xf32, #tpu.memory_space<vmem>>, vector<16x32xf32>
      %c0_86 = arith.constant 0 : index
      %c0_87 = arith.constant 0 : index
      %160 = vector.load %arg19[%c0_86, %c0_87] : memref<16x32xf32, #tpu.memory_space<vmem>>, vector<16x32xf32>
      tpu.vector_store %arg19[%c0_86, %c0_87], %159 {strides = array<i32>} : memref<16x32xf32, #tpu.memory_space<vmem>>, vector<16x32xf32>,
    } else {
    }
    %c0 = arith.constant 0 : index
    %c0_1 = arith.constant 0 : index
    %3 = vector.load %arg19[%c0, %c0_1] : memref<16x32xf32, #tpu.memory_space<vmem>>, vector<16x32xf32>
    %4 = arith.truncf %3 : vector<16x32xf32> to vector<16x32xbf16>
    %c0_2 = arith.constant 0 : index
    %c0_3 = arith.constant 0 : index
    %c0_4 = arith.constant 0 : index
    %5 = vector.load %arg3[%c0_2, %c0_3, %c0_4] : memref<1x32x32xbf16, #tpu.memory_space<vmem>>, vector<1x32x32xbf16>
    %6 = vector.shape_cast %5 : vector<1x32x32xbf16> to vector<32x32xbf16>
    %cst = arith.constant dense<0.000000e+00> : vector<16x32xf32>
    %7 = tpu.matmul %4, %6, %cst {dimension_numbers = #tpu.dot_dimension_numbers<[1], [0], [0], [1], [0, 0, 1, 1], [], []>} : vector<16x32xbf16>, vector<32x32xbf16>, vector<16x32xf32> -> vector<16x32xf32>
    %c0_5 = arith.constant 0 : index
    %c0_6 = arith.constant 0 : index
    %c0_7 = arith.constant 0 : index
    %8 = vector.load %arg4[%c0_5, %c0_6, %c0_7] : memref<1x1x32xf32, #tpu.memory_space<vmem>>, vector<1x1x32xf32>
    %9 = vector.shape_cast %8 : vector<1x1x32xf32> to vector<1x32xf32>
    %10 = vector.broadcast %9 : vector<1x32xf32> to vector<16x32xf32>
    %11 = arith.addf %7, %10 : vector<16x32xf32>
    %c0_8 = arith.constant 0 : index
    %c0_9 = arith.constant 0 : index
    %c0_10 = arith.constant 0 : index
    %12 = vector.load %arg5[%c0_8, %c0_9, %c0_10] : memref<1x32x32xbf16, #tpu.memory_space<vmem>>, vector<1x32x32xbf16>
    %13 = vector.shape_cast %12 : vector<1x32x32xbf16> to vector<32x32xbf16>
    %cst_11 = arith.constant dense<0.000000e+00> : vector<16x32xf32>
    %14 = tpu.matmul %4, %13, %cst_11 {dimension_numbers = #tpu.dot_dimension_numbers<[1], [0], [0], [1], [0, 0, 1, 1], [], []>} : vector<16x32xbf16>, vector<32x32xbf16>, vector<16x32xf32> -> vector<16x32xf32>
    %c0_12 = arith.constant 0 : index
    %c0_13 = arith.constant 0 : index
    %c0_14 = arith.constant 0 : index
    %15 = vector.load %arg6[%c0_12, %c0_13, %c0_14] : memref<1x1x32xf32, #tpu.memory_space<vmem>>, vector<1x1x32xf32>
    %16 = vector.shape_cast %15 : vector<1x1x32xf32> to vector<1x32xf32>
    %17 = vector.broadcast %16 : vector<1x32xf32> to vector<16x32xf32>
    %18 = arith.addf %14, %17 : vector<16x32xf32>
    %c0_15 = arith.constant 0 : index
    %c0_16 = arith.constant 0 : index
    %c0_17 = arith.constant 0 : index
    %19 = vector.load %arg7[%c0_15, %c0_16, %c0_17] : memref<1x32x32xbf16, #tpu.memory_space<vmem>>, vector<1x32x32xbf16>
    %20 = vector.shape_cast %19 : vector<1x32x32xbf16> to vector<32x32xbf16>
    %cst_18 = arith.constant dense<0.000000e+00> : vector<16x32xf32>
    %21 = tpu.matmul %4, %20, %cst_18 {dimension_numbers = #tpu.dot_dimension_numbers<[1], [0], [0], [1], [0, 0, 1, 1], [], []>} : vector<16x32xbf16>, vector<32x32xbf16>, vector<16x32xf32> -> vector<16x32xf32>
    %c0_19 = arith.constant 0 : index
    %c0_20 = arith.constant 0 : index
    %c0_21 = arith.constant 0 : index
    %22 = vector.load %arg8[%c0_19, %c0_20, %c0_21] : memref<1x1x32xf32, #tpu.memory_space<vmem>>, vector<1x1x32xf32>
    %23 = vector.shape_cast %22 : vector<1x1x32xf32> to vector<1x32xf32>
    %24 = vector.broadcast %23 : vector<1x32xf32> to vector<16x32xf32>
    %25 = arith.addf %21, %24 : vector<16x32xf32>
    %c0_22 = arith.constant 0 : index
    %c0_23 = arith.constant 0 : index
    %26 = vector.load %arg2[%c0_22, %c0_23] : memref<16x16xf32, #tpu.memory_space<vmem>>, vector<16x16xf32>
    %cst_24 = arith.constant 0.000000e+00 : f32
    %27 = vector.broadcast %cst_24 : f32 to vector<16x32xf32>
    %28 = vector.extract_strided_slice %11 {offsets = [0, 0], sizes = [16, 16], strides = [1, 1]} : vector<16x32xf32> to vector<16x16xf32>
    %29 = arith.truncf %28 : vector<16x16xf32> to vector<16x16xbf16>
    %30 = vector.extract_strided_slice %18 {offsets = [0, 0], sizes = [16, 16], strides = [1, 1]} : vector<16x32xf32> to vector<16x16xf32>
    %31 = arith.truncf %30 : vector<16x16xf32> to vector<16x16xbf16>
    %32 = vector.extract_strided_slice %25 {offsets = [0, 0], sizes = [16, 16], strides = [1, 1]} : vector<16x32xf32> to vector<16x16xf32>
    %33 = arith.truncf %32 : vector<16x16xf32> to vector<16x16xbf16>
    %cst_25 = arith.constant dense<0.000000e+00> : vector<16x16xf32>
    %34 = tpu.matmul %29, %31, %cst_25 {dimension_numbers = #tpu.dot_dimension_numbers<[1], [1], [0], [0], [0, 0, 1, 0], [], []>} : vector<16x16xbf16>, vector<16x16xbf16>, vector<16x16xf32> -> vector<16x16xf32>
    %cst_26 = arith.constant 2.500000e-01 : f32
    %35 = vector.broadcast %cst_26 : f32 to vector<16x16xf32>
    %36 = arith.mulf %34, %35 : vector<16x16xf32>
    %37 = arith.addf %36, %26 : vector<16x16xf32>
    %cst_27 = arith.constant dense<0xFF800000> : vector<16xf32>
    %38 = vector.multi_reduction <maximumf>, %37, %cst_27 [1] : vector<16x16xf32> to vector<16xf32>
    %39 = vector.shape_cast %38 : vector<16xf32> to vector<16x1xf32>
    %40 = vector.broadcast %39 : vector<16x1xf32> to vector<16x16xf32>
    %41 = arith.subf %37, %40 : vector<16x16xf32>
    %42 = math.exp %41 : vector<16x16xf32>
    %cst_28 = arith.constant dense<0.000000e+00> : vector<16xf32>
    %43 = vector.multi_reduction <add>, %42, %cst_28 [1] : vector<16x16xf32> to vector<16xf32>
    %44 = vector.shape_cast %43 : vector<16xf32> to vector<16x1xf32>
    %45 = tpu.reciprocal %44 {approx = true} : vector<16x1xf32> -> vector<16x1xf32>
    %46 = vector.broadcast %45 : vector<16x1xf32> to vector<16x16xf32>
    %47 = arith.mulf %42, %46 : vector<16x16xf32>
    %48 = arith.truncf %47 : vector<16x16xf32> to vector<16x16xbf16>
    %cst_29 = arith.constant dense<0.000000e+00> : vector<16x16xf32>
    %49 = tpu.matmul %48, %33, %cst_29 {dimension_numbers = #tpu.dot_dimension_numbers<[1], [0], [0], [1], [0, 0, 1, 1], [], []>} : vector<16x16xbf16>, vector<16x16xbf16>, vector<16x16xf32> -> vector<16x16xf32>
    %50 = arith.truncf %49 : vector<16x16xf32> to vector<16x16xbf16>
    %c0_30 = arith.constant 0 : index
    %c0_31 = arith.constant 0 : index
    %c0_32 = arith.constant 0 : index
    %51 = vector.load %arg9[%c0_30, %c0_31, %c0_32] : memref<1x32x32xbf16, #tpu.memory_space<vmem>>, vector<1x16x32xbf16>
    %52 = vector.shape_cast %51 : vector<1x16x32xbf16> to vector<16x32xbf16>
    %cst_33 = arith.constant dense<0.000000e+00> : vector<16x32xf32>
    %53 = tpu.matmul %50, %52, %cst_33 {dimension_numbers = #tpu.dot_dimension_numbers<[1], [0], [0], [1], [0, 0, 1, 1], [], []>} : vector<16x16xbf16>, vector<16x32xbf16>, vector<16x32xf32> -> vector<16x32xf32>
    %54 = arith.addf %27, %53 : vector<16x32xf32>
    %55 = vector.extract_strided_slice %11 {offsets = [0, 16], sizes = [16, 16], strides = [1, 1]} : vector<16x32xf32> to vector<16x16xf32>
    %56 = arith.truncf %55 : vector<16x16xf32> to vector<16x16xbf16>
    %57 = vector.extract_strided_slice %18 {offsets = [0, 16], sizes = [16, 16], strides = [1, 1]} : vector<16x32xf32> to vector<16x16xf32>
    %58 = arith.truncf %57 : vector<16x16xf32> to vector<16x16xbf16>
    %59 = vector.extract_strided_slice %25 {offsets = [0, 16], sizes = [16, 16], strides = [1, 1]} : vector<16x32xf32> to vector<16x16xf32>
    %60 = arith.truncf %59 : vector<16x16xf32> to vector<16x16xbf16>
    %cst_34 = arith.constant dense<0.000000e+00> : vector<16x16xf32>
    %61 = tpu.matmul %56, %58, %cst_34 {dimension_numbers = #tpu.dot_dimension_numbers<[1], [1], [0], [0], [0, 0, 1, 0], [], []>} : vector<16x16xbf16>, vector<16x16xbf16>, vector<16x16xf32> -> vector<16x16xf32>
    %cst_35 = arith.constant 2.500000e-01 : f32
    %62 = vector.broadcast %cst_35 : f32 to vector<16x16xf32>
    %63 = arith.mulf %61, %62 : vector<16x16xf32>
    %64 = arith.addf %63, %26 : vector<16x16xf32>
    %cst_36 = arith.constant dense<0xFF800000> : vector<16xf32>
    %65 = vector.multi_reduction <maximumf>, %64, %cst_36 [1] : vector<16x16xf32> to vector<16xf32>
    %66 = vector.shape_cast %65 : vector<16xf32> to vector<16x1xf32>
    %67 = vector.broadcast %66 : vector<16x1xf32> to vector<16x16xf32>
    %68 = arith.subf %64, %67 : vector<16x16xf32>
    %69 = math.exp %68 : vector<16x16xf32>
    %cst_37 = arith.constant dense<0.000000e+00> : vector<16xf32>
    %70 = vector.multi_reduction <add>, %69, %cst_37 [1] : vector<16x16xf32> to vector<16xf32>
    %71 = vector.shape_cast %70 : vector<16xf32> to vector<16x1xf32>
    %72 = tpu.reciprocal %71 {approx = true} : vector<16x1xf32> -> vector<16x1xf32>
    %73 = vector.broadcast %72 : vector<16x1xf32> to vector<16x16xf32>
    %74 = arith.mulf %69, %73 : vector<16x16xf32>
    %75 = arith.truncf %74 : vector<16x16xf32> to vector<16x16xbf16>
    %cst_38 = arith.constant dense<0.000000e+00> : vector<16x16xf32>
    %76 = tpu.matmul %75, %60, %cst_38 {dimension_numbers = #tpu.dot_dimension_numbers<[1], [0], [0], [1], [0, 0, 1, 1], [], []>} : vector<16x16xbf16>, vector<16x16xbf16>, vector<16x16xf32> -> vector<16x16xf32>
    %77 = arith.truncf %76 : vector<16x16xf32> to vector<16x16xbf16>
    %c0_39 = arith.constant 0 : index
    %c16 = arith.constant 16 : index
    %c0_40 = arith.constant 0 : index
    %78 = vector.load %arg9[%c0_39, %c16, %c0_40] : memref<1x32x32xbf16, #tpu.memory_space<vmem>>, vector<1x16x32xbf16>
    %79 = vector.shape_cast %78 : vector<1x16x32xbf16> to vector<16x32xbf16>
    %cst_41 = arith.constant dense<0.000000e+00> : vector<16x32xf32>
    %80 = tpu.matmul %77, %79, %cst_41 {dimension_numbers = #tpu.dot_dimension_numbers<[1], [0], [0], [1], [0, 0, 1, 1], [], []>} : vector<16x16xbf16>, vector<16x32xbf16>, vector<16x32xf32> -> vector<16x32xf32>
    %81 = arith.addf %54, %80 : vector<16x32xf32>
    %c0_42 = arith.constant 0 : index
    %c0_43 = arith.constant 0 : index
    %c0_44 = arith.constant 0 : index
    %82 = vector.load %arg10[%c0_42, %c0_43, %c0_44] : memref<1x1x32xf32, #tpu.memory_space<vmem>>, vector<1x1x32xf32>
    %83 = vector.shape_cast %82 : vector<1x1x32xf32> to vector<1x32xf32>
    %84 = vector.broadcast %83 : vector<1x32xf32> to vector<16x32xf32>
    %85 = arith.addf %81, %84 : vector<16x32xf32>
    %86 = arith.addf %3, %85 : vector<16x32xf32>
    %c0_45 = arith.constant 0 : index
    %c0_46 = arith.constant 0 : index
    %c0_47 = arith.constant 0 : index
    %87 = vector.load %arg11[%c0_45, %c0_46, %c0_47] : memref<1x1x32xf32, #tpu.memory_space<vmem>>, vector<1x1x32xf32>
    %88 = vector.shape_cast %87 : vector<1x1x32xf32> to vector<1x32xf32>
    %c0_48 = arith.constant 0 : index
    %c0_49 = arith.constant 0 : index
    %c0_50 = arith.constant 0 : index
    %89 = vector.load %arg12[%c0_48, %c0_49, %c0_50] : memref<1x1x32xf32, #tpu.memory_space<vmem>>, vector<1x1x32xf32>
    %90 = vector.shape_cast %89 : vector<1x1x32xf32> to vector<1x32xf32>
    %cst_51 = arith.constant dense<0.000000e+00> : vector<16xf32>
    %91 = vector.multi_reduction <add>, %86, %cst_51 [1] : vector<16x32xf32> to vector<16xf32>
    %92 = vector.shape_cast %91 : vector<16xf32> to vector<16x1xf32>
    %cst_52 = arith.constant 3.200000e+01 : f32
    %93 = vector.broadcast %cst_52 : f32 to vector<16x1xf32>
    %94 = arith.divf %92, %93 : vector<16x1xf32>
    %95 = vector.broadcast %94 : vector<16x1xf32> to vector<16x32xf32>
    %96 = arith.subf %86, %95 : vector<16x32xf32>
    %97 = arith.mulf %96, %96 : vector<16x32xf32>
    %cst_53 = arith.constant dense<0.000000e+00> : vector<16xf32>
    %98 = vector.multi_reduction <add>, %97, %cst_53 [1] : vector<16x32xf32> to vector<16xf32>
    %99 = vector.shape_cast %98 : vector<16xf32> to vector<16x1xf32>
    %cst_54 = arith.constant 3.200000e+01 : f32
    %100 = vector.broadcast %cst_54 : f32 to vector<16x1xf32>
    %101 = arith.divf %99, %100 : vector<16x1xf32>
    %102 = vector.broadcast %94 : vector<16x1xf32> to vector<16x32xf32>
    %103 = arith.subf %86, %102 : vector<16x32xf32>
    %cst_55 = arith.constant 9.99999974E-6 : f32
    %104 = vector.broadcast %cst_55 : f32 to vector<16x1xf32>
    %105 = arith.addf %101, %104 : vector<16x1xf32>
    %106 = math.rsqrt %105 : vector<16x1xf32>
    %107 = vector.broadcast %106 : vector<16x1xf32> to vector<16x32xf32>
    %108 = arith.mulf %103, %107 : vector<16x32xf32>
    %109 = vector.broadcast %88 : vector<1x32xf32> to vector<16x32xf32>
    %110 = arith.mulf %108, %109 : vector<16x32xf32>
    %111 = vector.broadcast %90 : vector<1x32xf32> to vector<16x32xf32>
    %112 = arith.addf %110, %111 : vector<16x32xf32>
    %113 = arith.truncf %112 : vector<16x32xf32> to vector<16x32xbf16>
    %c0_56 = arith.constant 0 : index
    %c0_57 = arith.constant 0 : index
    %c0_58 = arith.constant 0 : index
    %114 = vector.load %arg13[%c0_56, %c0_57, %c0_58] : memref<1x32x64xbf16, #tpu.memory_space<vmem>>, vector<1x32x64xbf16>
    %115 = vector.shape_cast %114 : vector<1x32x64xbf16> to vector<32x64xbf16>
    %cst_59 = arith.constant dense<0.000000e+00> : vector<16x64xf32>
    %116 = tpu.matmul %113, %115, %cst_59 {dimension_numbers = #tpu.dot_dimension_numbers<[1], [0], [0], [1], [0, 0, 1, 1], [], []>} : vector<16x32xbf16>, vector<32x64xbf16>, vector<16x64xf32> -> vector<16x64xf32>
    %c0_60 = arith.constant 0 : index
    %c0_61 = arith.constant 0 : index
    %c0_62 = arith.constant 0 : index
    %117 = vector.load %arg14[%c0_60, %c0_61, %c0_62] : memref<1x1x64xf32, #tpu.memory_space<vmem>>, vector<1x1x64xf32>
    %118 = vector.shape_cast %117 : vector<1x1x64xf32> to vector<1x64xf32>
    %119 = vector.broadcast %118 : vector<1x64xf32> to vector<16x64xf32>
    %120 = arith.addf %116, %119 : vector<16x64xf32>
    %cst_63 = arith.constant 0.000000e+00 : f32
    %121 = vector.broadcast %cst_63 : f32 to vector<16x64xf32>
    %122 = arith.maximumf %120, %121 : vector<16x64xf32>
    %123 = arith.truncf %122 : vector<16x64xf32> to vector<16x64xbf16>
    %c0_64 = arith.constant 0 : index
    %c0_65 = arith.constant 0 : index
    %c0_66 = arith.constant 0 : index
    %124 = vector.load %arg15[%c0_64, %c0_65, %c0_66] : memref<1x64x32xbf16, #tpu.memory_space<vmem>>, vector<1x64x32xbf16>
    %125 = vector.shape_cast %124 : vector<1x64x32xbf16> to vector<64x32xbf16>
    %cst_67 = arith.constant dense<0.000000e+00> : vector<16x32xf32>
    %126 = tpu.matmul %123, %125, %cst_67 {dimension_numbers = #tpu.dot_dimension_numbers<[1], [0], [0], [1], [0, 0, 1, 1], [], []>} : vector<16x64xbf16>, vector<64x32xbf16>, vector<16x32xf32> -> vector<16x32xf32>
    %c0_68 = arith.constant 0 : index
    %c0_69 = arith.constant 0 : index
    %c0_70 = arith.constant 0 : index
    %127 = vector.load %arg16[%c0_68, %c0_69, %c0_70] : memref<1x1x32xf32, #tpu.memory_space<vmem>>, vector<1x1x32xf32>
    %128 = vector.shape_cast %127 : vector<1x1x32xf32> to vector<1x32xf32>
    %129 = vector.broadcast %128 : vector<1x32xf32> to vector<16x32xf32>
    %130 = arith.addf %126, %129 : vector<16x32xf32>
    %131 = arith.addf %112, %130 : vector<16x32xf32>
    %c0_71 = arith.constant 0 : index
    %c0_72 = arith.constant 0 : index
    %c0_73 = arith.constant 0 : index
    %132 = vector.load %arg17[%c0_71, %c0_72, %c0_73] : memref<1x1x32xf32, #tpu.memory_space<vmem>>, vector<1x1x32xf32>
    %133 = vector.shape_cast %132 : vector<1x1x32xf32> to vector<1x32xf32>
    %c0_74 = arith.constant 0 : index
    %c0_75 = arith.constant 0 : index
    %c0_76 = arith.constant 0 : index
    %134 = vector.load %arg18[%c0_74, %c0_75, %c0_76] : memref<1x1x32xf32, #tpu.memory_space<vmem>>, vector<1x1x32xf32>
    %135 = vector.shape_cast %134 : vector<1x1x32xf32> to vector<1x32xf32>
    %cst_77 = arith.constant dense<0.000000e+00> : vector<16xf32>
    %136 = vector.multi_reduction <add>, %131, %cst_77 [1] : vector<16x32xf32> to vector<16xf32>
    %137 = vector.shape_cast %136 : vector<16xf32> to vector<16x1xf32>
    %cst_78 = arith.constant 3.200000e+01 : f32
    %138 = vector.broadcast %cst_78 : f32 to vector<16x1xf32>
    %139 = arith.divf %137, %138 : vector<16x1xf32>
    %140 = vector.broadcast %139 : vector<16x1xf32> to vector<16x32xf32>
    %141 = arith.subf %131, %140 : vector<16x32xf32>
    %142 = arith.mulf %141, %141 : vector<16x32xf32>
    %cst_79 = arith.constant dense<0.000000e+00> : vector<16xf32>
    %143 = vector.multi_reduction <add>, %142, %cst_79 [1] : vector<16x32xf32> to vector<16xf32>
    %144 = vector.shape_cast %143 : vector<16xf32> to vector<16x1xf32>
    %cst_80 = arith.constant 3.200000e+01 : f32
    %145 = vector.broadcast %cst_80 : f32 to vector<16x1xf32>
    %146 = arith.divf %144, %145 : vector<16x1xf32>
    %147 = vector.broadcast %139 : vector<16x1xf32> to vector<16x32xf32>
    %148 = arith.subf %131, %147 : vector<16x32xf32>
    %cst_81 = arith.constant 9.99999974E-6 : f32
    %149 = vector.broadcast %cst_81 : f32 to vector<16x1xf32>
    %150 = arith.addf %146, %149 : vector<16x1xf32>
    %151 = math.rsqrt %150 : vector<16x1xf32>
    %152 = vector.broadcast %151 : vector<16x1xf32> to vector<16x32xf32>
    %153 = arith.mulf %148, %152 : vector<16x32xf32>
    %154 = vector.broadcast %133 : vector<1x32xf32> to vector<16x32xf32>
    %155 = arith.mulf %153, %154 : vector<16x32xf32>
    %156 = vector.broadcast %135 : vector<1x32xf32> to vector<16x32xf32>
    %157 = arith.addf %155, %156 : vector<16x32xf32>
    %c0_82 = arith.constant 0 : index
    %c0_83 = arith.constant 0 : index
    %158 = vector.load %arg19[%c0_82, %c0_83] : memref<16x32xf32, #tpu.memory_space<vmem>>, vector<16x32xf32>
    tpu.vector_store %arg19[%c0_82, %c0_83], %157 {strides = array<i32>} : memref<16x32xf32, #tpu.memory_space<vmem>>, vector<16x32xf32>,
    return
  }
  func.func @transform_0(%arg0: i32) -> (i32, i32) {
    %c0_i32 = arith.constant 0 : i32
    %c0_i32_0 = arith.constant 0 : i32
    %c0_i32_1 = arith.constant 0 : i32
    return %c0_i32, %c0_i32_0 : i32, i32
  }
  func.func @transform_1(%arg0: i32) -> (i32, i32) {
    %c0_i32 = arith.constant 0 : i32
    %c0_i32_0 = arith.constant 0 : i32
    %c0_i32_1 = arith.constant 0 : i32
    return %c0_i32, %c0_i32_0 : i32, i32
  }
  func.func @transform_2(%arg0: i32) -> (i32, i32, i32) {
    %c0_i32 = arith.constant 0 : i32
    %c0_i32_0 = arith.constant 0 : i32
    %c0_i32_1 = arith.constant 0 : i32
    return %arg0, %c0_i32, %c0_i32_0 : i32, i32, i32
  }
  func.func @transform_3(%arg0: i32) -> (i32, i32, i32) {
    %c0_i32 = arith.constant 0 : i32
    %c0_i32_0 = arith.constant 0 : i32
    %c0_i32_1 = arith.constant 0 : i32
    return %arg0, %c0_i32, %c0_i32_0 : i32, i32, i32
  }
  func.func @transform_4(%arg0: i32) -> (i32, i32, i32) {
    %c0_i32 = arith.constant 0 : i32
    %c0_i32_0 = arith.constant 0 : i32
    %c0_i32_1 = arith.constant 0 : i32
    return %arg0, %c0_i32, %c0_i32_0 : i32, i32, i32
  }
  func.func @transform_5(%arg0: i32) -> (i32, i32, i32) {
    %c0_i32 = arith.constant 0 : i32
    %c0_i32_0 = arith.constant 0 : i32
    %c0_i32_1 = arith.constant 0 : i32
    return %arg0, %c0_i32, %c0_i32_0 : i32, i32, i32
  }
  func.func @transform_6(%arg0: i32) -> (i32, i32, i32) {
    %c0_i32 = arith.constant 0 : i32
    %c0_i32_0 = arith.constant 0 : i32
    %c0_i32_1 = arith.constant 0 : i32
    return %arg0, %c0_i32, %c0_i32_0 : i32, i32, i32
  }
  func.func @transform_7(%arg0: i32) -> (i32, i32, i32) {
    %c0_i32 = arith.constant 0 : i32
    %c0_i32_0 = arith.constant 0 : i32
    %c0_i32_1 = arith.constant 0 : i32
    return %arg0, %c0_i32, %c0_i32_0 : i32, i32, i32
  }
  func.func @transform_8(%arg0: i32) -> (i32, i32, i32) {
    %c0_i32 = arith.constant 0 : i32
    %c0_i32_0 = arith.constant 0 : i32
    %c0_i32_1 = arith.constant 0 : i32
    return %arg0, %c0_i32, %c0_i32_0 : i32, i32, i32
  }
  func.func @transform_9(%arg0: i32) -> (i32, i32, i32) {
    %c0_i32 = arith.constant 0 : i32
    %c0_i32_0 = arith.constant 0 : i32
    %c0_i32_1 = arith.constant 0 : i32
    return %arg0, %c0_i32, %c0_i32_0 : i32, i32, i32
  }
  func.func @transform_10(%arg0: i32) -> (i32, i32, i32) {
    %c0_i32 = arith.constant 0 : i32
    %c0_i32_0 = arith.constant 0 : i32
    %c0_i32_1 = arith.constant 0 : i32
    return %arg0, %c0_i32, %c0_i32_0 : i32, i32, i32
  }
  func.func @transform_11(%arg0: i32) -> (i32, i32, i32) {
    %c0_i32 = arith.constant 0 : i32
    %c0_i32_0 = arith.constant 0 : i32
    %c0_i32_1 = arith.constant 0 : i32
    return %arg0, %c0_i32, %c0_i32_0 : i32, i32, i32
  }
  func.func @transform_12(%arg0: i32) -> (i32, i32, i32) {
    %c0_i32 = arith.constant 0 : i32
    %c0_i32_0 = arith.constant 0 : i32
    %c0_i32_1 = arith.constant 0 : i32
    return %arg0, %c0_i32, %c0_i32_0 : i32, i32, i32
  }
  func.func @transform_13(%arg0: i32) -> (i32, i32, i32) {
    %c0_i32 = arith.constant 0 : i32
    %c0_i32_0 = arith.constant 0 : i32
    %c0_i32_1 = arith.constant 0 : i32
    return %arg0, %c0_i32, %c0_i32_0 : i32, i32, i32
  }
  func.func @transform_14(%arg0: i32) -> (i32, i32, i32) {
    %c0_i32 = arith.constant 0 : i32
    %c0_i32_0 = arith.constant 0 : i32
    %c0_i32_1 = arith.constant 0 : i32
    return %arg0, %c0_i32, %c0_i32_0 : i32, i32, i32
  }
  func.func @transform_15(%arg0: i32) -> (i32, i32, i32) {
    %c0_i32 = arith.constant 0 : i32
    %c0_i32_0 = arith.constant 0 : i32
    %c0_i32_1 = arith.constant 0 : i32
    return %arg0, %c0_i32, %c0_i32_0 : i32, i32, i32
  }
  func.func @transform_16(%arg0: i32) -> (i32, i32, i32) {
    %c0_i32 = arith.constant 0 : i32
    %c0_i32_0 = arith.constant 0 : i32
    %c0_i32_1 = arith.constant 0 : i32
    return %arg0, %c0_i32, %c0_i32_0 : i32, i32, i32
  }
  func.func @transform_17(%arg0: i32) -> (i32, i32, i32) {
    %c0_i32 = arith.constant 0 : i32
    %c0_i32_0 = arith.constant 0 : i32
    %c0_i32_1 = arith.constant 0 : i32
    return %arg0, %c0_i32, %c0_i32_0 : i32, i32, i32
  }
  func.func @transform_18(%arg0: i32) -> (i32, i32) {
    %c0_i32 = arith.constant 0 : i32
    %c0_i32_0 = arith.constant 0 : i32
    %c0_i32_1 = arith.constant 0 : i32
    return %c0_i32, %c0_i32_0 : i32, i32
  }
}

</mosaic_0001>

<bundles_post_ra>
// kernel: tpu_custom_call.1
= control target key start
LH: loop header
LB: loop body
LE: loop exit
PB: predicated region body
PF: predicated region fallthrough
CT: control target
= control target key end

     0   :  { %s2992_s0 = inlined_call_operand.hbm [shape: f32[16,32], index: 0, kind: input, shape index: {}]   ;;  %s2993_s1 = inlined_call_operand.hbm [shape: f32[16,16], index: 1, kind: input, shape index: {}]   ;;  %s2994_s2 = inlined_call_operand.vmem [shape: bf16[2,32,32], index: 2, kind: input, shape index: {}]   ;;  %s2995_s3 = inlined_call_operand.vmem [shape: f32[2,1,32], index: 3, kind: input, shape index: {}]   ;;  %s2996_s4 = inlined_call_operand.vmem [shape: bf16[2,32,32], index: 4, kind: input, shape index: {}]   ;;  %s2997_s5 = inlined_call_operand.vmem [shape: f32[2,1,32], index: 5, kind: input, shape index: {}]   ;;  %s2998_s6 = inlined_call_operand.vmem [shape: bf16[2,32,32], index: 6, kind: input, shape index: {}]   ;;  %s2999_s7 = inlined_call_operand.vmem [shape: f32[2,1,32], index: 7, kind: input, shape index: {}]   ;;  %s3000_s8 = inlined_call_operand.hbm [shape: bf16[2,32,32], index: 8, kind: input, shape index: {}]   ;;  %s3001_s9 = inlined_call_operand.vmem [shape: f32[2,1,32], index: 9, kind: input, shape index: {}]   ;;  %s3002_s10 = inlined_call_operand.vmem [shape: f32[2,1,32], index: 10, kind: input, shape index: {}]   ;;  %s3003_s11 = inlined_call_operand.vmem [shape: f32[2,1,32], index: 11, kind: input, shape index: {}]   ;;  %s3004_s12 = inlined_call_operand.hbm [shape: bf16[2,32,64], index: 12, kind: input, shape index: {}]   ;;  %s3005_s13 = inlined_call_operand.vmem [shape: f32[2,1,64], index: 13, kind: input, shape index: {}]   ;;  %s3006_s14 = inlined_call_operand.vmem [shape: bf16[2,64,32], index: 14, kind: input, shape index: {}]   ;;  %s3007_s15 = inlined_call_operand.vmem [shape: f32[2,1,32], index: 15, kind: input, shape index: {}]   ;;  %s3008_s16 = inlined_call_operand.vmem [shape: f32[2,1,32], index: 16, kind: input, shape index: {}]   ;;  %s3009_s17 = inlined_call_operand.vmem [shape: f32[2,1,32], index: 17, kind: input, shape index: {}]   ;;  %s3010_s18 = inlined_call_operand.hbm [shape: f32[16,32], index: 18, kind: output, shape index: {}]  }
   0x1   :  { %3028 = sst [smem:[#allocation17_spill]] %s2992_s0 }
   0x2   :  { %3029 = sst [smem:[#allocation18_spill]] %s2993_s1 }
   0x3   :  { %3030 = sst [smem:[#allocation19_spill]] %s2994_s2 }
   0x4   :  { %3031 = sst [smem:[#allocation20_spill]] %s2996_s4 }
   0x5   :  { %3032 = sst [smem:[#allocation21_spill]] %s2998_s6 }
   0x6   :  { %3033 = sst [smem:[#allocation22_spill]] %s2999_s7 }
   0x7   :  { %3034 = sst [smem:[#allocation23_spill]] %s3000_s8 }
   0x8   :  { %3035 = sst [smem:[#allocation24_spill]] %s3001_s9 }
   0x9   :  { %3036 = sst [smem:[#allocation25_spill]] %s3002_s10 }
   0xa   :  { %3037 = sst [smem:[#allocation26_spill]] %s3003_s11 }
   0xb   :  { %3038 = sst [smem:[#allocation27_spill]] %s3004_s12 }
   0xc   :  { %3039 = sst [smem:[#allocation28_spill]] %s3005_s13 }
   0xd   :  { %3040 = sst [smem:[#allocation29_spill]] %s3006_s14 }
   0xe   :  { %3041 = sst [smem:[#allocation30_spill]] %s3007_s15 }
   0xf   :  { %3042 = sst [smem:[#allocation31_spill]] %s3008_s16 }
  0x10   :  { %3043 = sst [smem:[#allocation32_spill]] %s3009_s17 }
  0x11   :  { %3044 = sst [smem:[#allocation33_spill]] %s3010_s18 }
  0x12   :  { %23 = vsyncpa [#allocation3], 0 }
  0x13   :  { %24 = vsyncpa [#allocation6], 0 }
  0x14   :  { %25 = vsyncpa [#allocation4], 0  ;;  %s2525_s27 = smov 0   ;;  %s2527_s28 = smov 0  }
  0x15   :  { %s2529_s29 = smov 0   ;;  %s2531_s30 = smov 0  }
  0x16 LB: > { %3045 = sst [smem:[#allocation14_spill]] %s2410_s29  ;;  %s2544_s0 = sadd.s32 4294967295, %s2414_s30   ;;  %s2414_s30 = sphi %s2531_s30, %s3100_s30   ;;  %s2410_s29 = sphi %s2529_s29, %s3102_s29   ;;  %s2406_s28 = sphi %s2527_s28, %s3104_s28   ;;  %s2402_s27 = sphi %s2525_s27, %s3103_s27  }
  0x17   : > { %s2547_s19 = sadd.s32 1, %s2414_s30   ;;  %s236_s20 = sadd.s32 1, %s2410_s29 }
  0x18   : > { %3046 = sst [smem:[#allocation15_spill]] %s2547_s19  ;;  %s233_s1 = ssub.s32 %s2414_s30, %s2547_s19 }
  0x19   : > { %p234_p0 = scmp.eq.s32.totalorder %s233_s1, 0  ;;  %p243_p1 = scmp.ne.s32.totalorder %s2410_s29, %s2406_s28 }
  0x1a   : > { %p244_p2 = scmp.eq.s32.totalorder %s2414_s30, 0  ;;  %p249_p3 = scmp.ne.s32.totalorder %s2406_s28, %s2402_s27 }
  0x1b   : > { %s2557_s21 = scalar_select %p234_p0, %s2410_s29, %s236_s20  }
  0x1c   : > { %p2559_p4 = por %p244_p2, %p243_p1  ;;  %p3017_p5 = scmp.eq.s32.totalorder %s2544_s0, 0 }
  0x1d   : > { %3047 = sst [smem:[#allocation16_spill]] %s2557_s21  ;;  %p1929_p6 = scmp.ge.s32.totalorder %s2414_s30, 1 }
  0x1e   : > { %p515_p7 = scmp.lt.s32.totalorder %s2414_s30, 3  ;;  %p2568_p8 = por %p3017_p5, %p249_p3 }
  0x1f   : > { %s2416_s24 = smov [#allocation2]   ;;  %p2139_p13 = scmp.lt.s32.totalorder %s2414_s30, 2 }
  0x20   : > { %s3049_s2 = scalar_select %p2568_p8, 1, 0 }
  0x21   : > { %p2573_p10 = pnand %p1929_p6, %p515_p7  ;;  %s527_s25 = sshll.u32 %s2416_s24, 4  ;;  %s528_s25 = int_to_ptr.vmem [resolvable:$true] %s527_s25 }
  0x22   : > { %s596_s27 = sand.u32 1, %s2414_s30   ;;  %s598_s1 = sand.u32 1, %s2410_s29  }
  0x23   : > { %s3050_s23 = scalar_select %p2573_p10, 1, 0 }
  0x24   : > { %p2123_p11 = pneg %p2573_p10  ;;  %p2590_p0 = pnand %p2139_p13, %p2559_p4 }
  0x25   : > { %s3053_s19 = sld [smem:[#allocation17_spill]] }
  0x26   : > { %p2581_p12 = pnand %p2123_p11, %p3017_p5 }
  0x27   : > { %s3052_s20 = scalar_select %p2590_p0, 1, 0 }
  0x28   : > { %p3022_p2 = pneg %p2581_p12 }
  0x2b   : > { %s2226_s18 = scalar_lea.hbm %s3053_s19, 256 }
  0x2c   : > { %p2227_p1 = scmp.ne.s32.totalorder %s3053_s19, %s2226_s18  ;;  %p2233_p4 = scmp.lt.u32.totalorder %s2226_s18, %s3053_s19 }
  0x2e   : > { %p2229_p3 = pnand %p3022_p2, %p2227_p1 }
  0x30   : > { %p2230_p6 = pneg %p2229_p3 }
  0x32   : > { %p2235_p7 = pnand %p2233_p4, %p2230_p6 }
  0x34   : > { %2238 = shalt.err (!%p2235_p7)
}
  0x35   : > { %s2239_s15 = scalar_lea.vmem %s528_s25, 256  ;;  %p2247_p5 = scmp.lt.s32.totalorder %s528_s25, %s528_s25 }
  0x36   : > { %p2240_p11 = scmp.ne.s32.totalorder %s528_s25, %s2239_s15  ;;  %p2248_p8 = scmp.lt.s32.totalorder %s2239_s15, %s2239_s15 }
  0x38   : > { %p2242_p13 = pnand %p2240_p11, %p3022_p2  ;;  %p2249_p10 = por %p2248_p8, %p2247_p5 }
  0x3a   : > { %p2243_p9 = pneg %p2242_p13 }
  0x3c   : > { %p2250_p0 = pnand %p2249_p10, %p2243_p9 }
  0x3e   : > { %2253 = shalt.err (!%p2250_p0)
}
  0x3f   : > { %s3021_s16 = smov 128   ;;  %s3023_s17 = smov 8  }
  0x40   : > { %2126 = dma.hbm_to_vmem [thread:$0]  (!%p2581_p12), %s3053_s19, 256, %s528_s25, [#allocation3], %s3021_s16, %s3021_s16, %s3023_s17  }
  0x41   : > { %s2619_s21 = sshll.u32 %s598_s1, 4  ;;  %s1992_s15 = sshll.u32 %s2414_s30, 8 }
  0x42   : > { %s3054_s8 = sld [smem:[#allocation23_spill]]  ;;  %s600_s13 = scalar_lea.vmem [#allocation7], %s2619_s21 }
  0x43   : > { %s607_s11 = sshll.u32 %s600_s13, 4  ;;  %s2632_s18 = scalar_lea.sflag [#allocation3], %s596_s27  ;;  %s2630_s11 = int_to_ptr.vmem [resolvable:$true] %s607_s11 }
  0x44   : > { %p3055_p8 = scmp.ne.s32.totalorder %s3052_s20, 0 }
  0x46   : > { %p3025_p9 = pneg %p3055_p8 }
  0x48   : > { %s2627_s14 = scalar_lea.hbm %s3054_s8, %s1992_s15  ;;  %s2259_s24 = scalar_lea.hbm %s3054_s8, 512 }
  0x49   : > { %s2254_s25 = scalar_lea.hbm %s2627_s14, 256  ;;  %p2260_p1 = scmp.lt.u32.totalorder %s2627_s14, %s3054_s8 }
  0x4a   : > { %p2255_p5 = scmp.ne.s32.totalorder %s2627_s14, %s2254_s25  ;;  %p2261_p3 = scmp.lt.u32.totalorder %s2259_s24, %s2254_s25 }
  0x4b   : > { %p2263_p4 = scmp.lt.u32.totalorder %s2254_s25, %s2627_s14 }
  0x4c   : > { %p2257_p10 = pnand %p3025_p9, %p2255_p5  ;;  %p2262_p6 = por %p2261_p3, %p2260_p1 }
  0x4e   : > { %p2258_p0 = pneg %p2257_p10  ;;  %p2264_p7 = por %p2263_p4, %p2262_p6 }
  0x50   : > { %p2265_p11 = pnand %p2264_p7, %p2258_p0 }
  0x52   : > { %2268 = shalt.err (!%p2265_p11)
}
  0x53   : > { %s2269_s13 = scalar_lea.vmem %s2630_s11, 256  ;;  %s2419_s27 = smov [#allocation7]  }
  0x54   : > { %p2270_p13 = scmp.ne.s32.totalorder %s2630_s11, %s2269_s13  ;;  %s2274_s1 = sshll.u32 %s2419_s27, 4  ;;  %s2275_s1 = int_to_ptr.vmem [resolvable:$false] %s2274_s1 }
  0x55   : > { %s2276_s16 = scalar_lea.vmem %s2275_s1, 512  ;;  %p2277_p2 = scmp.lt.s32.totalorder %s2630_s11, %s2275_s1 }
  0x56   : > { %p2272_p5 = pnand %p2270_p13, %p3025_p9  ;;  %p2278_p1 = scmp.lt.s32.totalorder %s2276_s16, %s2269_s13 }
  0x58   : > { %p2273_p10 = pneg %p2272_p5  ;;  %p2279_p3 = por %p2278_p1, %p2277_p2 }
  0x5a   : > { %p2280_p6 = pnand %p2279_p3, %p2273_p10 }
  0x5c   : > { %2283 = shalt.err (!%p2280_p6)
}
  0x5d   : > { %s2420_s25 = smov 64   ;;  %s2421_s29 = smov 4  }
  0x5e   : > { %2133 = dma.hbm_to_vmem [thread:$0]  (!%p3055_p8), %s2627_s14, 256, %s2630_s11, %s2632_s18, %s2420_s25, %s2420_s25, %s2421_s29  }
  0x5f   : > { %s2422_s24 = smov [#allocation5]   ;;  %s3056_s12 = sld [smem:[#allocation27_spill]] }
  0x60   : > { %s540_s22 = sshll.u32 %s2422_s24, 4  ;;  %s639_s16 = scalar_lea.vmem [#allocation8], %s2619_s21  ;;  %s541_s22 = int_to_ptr.vmem [resolvable:$true] %s540_s22 }
  0x61   : > { %s646_s17 = sshll.u32 %s639_s16, 4  ;;  %s3057_s10 = sld [smem:[#allocation18_spill]]  ;;  %s2694_s17 = int_to_ptr.vmem [resolvable:$true] %s646_s17 }
  0x62   : > { %p3058_p0 = pneg %p2581_p12 }
  0x65   : > { %s2668_s1 = scalar_lea.hbm %s3056_s12, %s1992_s15 }
  0x67   : > { %s2284_s9 = scalar_lea.hbm %s3057_s10, 256 }
  0x68   : > { %p2285_p2 = scmp.ne.s32.totalorder %s3057_s10, %s2284_s9  ;;  %p2291_p11 = scmp.lt.u32.totalorder %s2284_s9, %s3057_s10 }
  0x6a   : > { %p2287_p4 = pnand %p2285_p2, %p3058_p0 }
  0x6c   : > { %p2288_p7 = pneg %p2287_p4 }
  0x6e   : > { %p2293_p13 = pnand %p2291_p11, %p2288_p7 }
  0x70   : > { %2296 = shalt.err (!%p2293_p13)
}
  0x71   : > { %s2297_s30 = scalar_lea.vmem %s541_s22, 256  ;;  %p3059_p10 = pmov %p3058_p0 }
  0x72   : > { %p2298_p5 = scmp.ne.s32.totalorder %s541_s22, %s2297_s30  ;;  %p2305_p6 = scmp.lt.s32.totalorder %s541_s22, %s541_s22 }
  0x73   : > { %p2306_p9 = scmp.lt.s32.totalorder %s2297_s30, %s2297_s30 }
  0x74   : > { %p2300_p1 = pnand %p2298_p5, %p3059_p10 }
  0x75   : > { %p2307_p8 = por %p2306_p9, %p2305_p6 }
  0x76   : > { %p2301_p3 = pneg %p2300_p1 }
  0x78   : > { %p2308_p0 = pnand %p2307_p8, %p2301_p3 }
  0x7a   : > { %2311 = shalt.err (!%p2308_p0)
}
  0x7b   : > { %s3060_s6 = smov 8   ;;  %s3061_s7 = smov 128  }
  0x7c   : > { %2129 = dma.hbm_to_vmem [thread:$0]  (!%p2581_p12), %s3057_s10, 256, %s541_s22, [#allocation6], %s3061_s7, %s3061_s7, %s3060_s6  }
  0x7d   : > { %s2312_s19 = scalar_lea.hbm %s2668_s1, 256  ;;  %p3062_p8 = scmp.ne.s32.totalorder %s3052_s20, 0 }
  0x7e   : > { %p2313_p9 = scmp.ne.s32.totalorder %s2668_s1, %s2312_s19  ;;  %s2317_s15 = scalar_lea.hbm %s3056_s12, 512 }
  0x7f   : > { %p3063_p2 = pneg %p3062_p8  ;;  %p2318_p11 = scmp.lt.u32.totalorder %s2668_s1, %s3056_s12 }
  0x80   : > { %p2319_p13 = scmp.lt.u32.totalorder %s2317_s15, %s2312_s19  ;;  %p2321_p10 = scmp.lt.u32.totalorder %s2312_s19, %s2668_s1 }
  0x81   : > { %p2315_p4 = pnand %p2313_p9, %p3063_p2 }
  0x82   : > { %p2320_p5 = por %p2319_p13, %p2318_p11 }
  0x83   : > { %p2316_p7 = pneg %p2315_p4 }
  0x84   : > { %p2322_p12 = por %p2321_p10, %p2320_p5 }
  0x86   : > { %p2323_p1 = pnand %p2322_p12, %p2316_p7 }
  0x88   : > { %2326 = shalt.err (!%p2323_p1)
}
  0x89   : > { %s2327_s22 = scalar_lea.vmem %s2694_s17, 256  ;;  %p3064_p6 = pmov %p3063_p2 }
  0x8a   : > { %p2328_p3 = scmp.ne.s32.totalorder %s2694_s17, %s2327_s22  ;;  %s2423_s27 = smov [#allocation8]  }
  0x8b   : > { %s2332_s16 = sshll.u32 %s2423_s27, 4  ;;  %s2333_s16 = int_to_ptr.vmem [resolvable:$false] %s2332_s16 }
  0x8c   : > { %p2330_p0 = pnand %p2328_p3, %p3064_p6  ;;  %s2334_s11 = scalar_lea.vmem %s2333_s16, 512 }
  0x8d   : > { %p2335_p2 = scmp.lt.s32.totalorder %s2694_s17, %s2333_s16  ;;  %p2336_p4 = scmp.lt.s32.totalorder %s2334_s11, %s2327_s22 }
  0x8e   : > { %p2331_p9 = pneg %p2330_p0 }
  0x8f   : > { %p2337_p11 = por %p2336_p4, %p2335_p2 }
  0x91   : > { %p2338_p13 = pnand %p2337_p11, %p2331_p9 }
  0x93   : > { %2341 = shalt.err (!%p2338_p13)
}
  0x94   : > { %2136 = dma.hbm_to_vmem [thread:$0]  (!%p3062_p8), %s2668_s1, 256, %s2694_s17, %s2632_s18, %s2420_s25, %s2420_s25, %s2421_s29  }
  0x95   : > { %p3065_p7 = scmp.ne.s32.totalorder %s3050_s23, 0 }
  0x96   : > { %p3066_p5 = scmp.eq.s32.totalorder (!%p3065_p7), %s2544_s0, 0 }
  0x97   : > { %690 = sbr.rel (%p3065_p7) target bundleno = 2608 (0xa30), region = 92 }
  0x9e   : > { %2385 = dma.done.wait (%p3066_p5), [#allocation3], 256   ;;  %p3067_p10 = pmov %p3066_p5 }
  0x9f   : > { %p3068_p12 = pmov %p3066_p5 }
  0xa0   : > { %2387 = vsyncadd (%p3067_p10), [#allocation3], 4294967040 }
  0xa1   : > { %2389 = dma.done.wait (%p3068_p12), [#allocation6], 256   ;;  %p3069_p1 = pmov %p3066_p5 }
  0xa2   : > { %s700_s20 = sand.u32 1, %s2544_s0   ;;  %s702_s17 = sand.u32 1, %s2406_s28  }
  0xa3   : > { %2391 = vsyncadd (%p3069_p1), [#allocation6], 4294967040  ;;  %s2735_s18 = sshll.u32 %s702_s17, 4  ;;  %s701_s23 = scalar_lea.sflag [#allocation3], %s700_s20 }
  0xa4   : > { %p3070_p8 = scmp.ne.s32.totalorder %s3049_s2, 0 }
  0xa6   : > { %2393 = dma.done.wait (%p3070_p8), %s701_s23, 512  }
  0xa7   : > { %2395 = vsyncadd (%p3070_p8), %s701_s23, 4294966784  ;;  %p816_p3 = scmp.lt.s32.totalorder %s2544_s0, 1  ;;  %s3071_s8 = sld [smem:[#allocation19_spill]] }
  0xa8   : > { %s3072_s4 = sld [smem:[#allocation20_spill]]  ;;  %s3073_s16 = sld [smem:[#allocation21_spill]] }
  0xa9   : > { %s2744_s29 = scalar_select %p816_p3, %s2544_s0, 1 }
  0xaa   : > { %s3074_s23 = sld [smem:[#allocation22_spill]]  ;;  %s3079_s17 = sld [smem:[#allocation29_spill]] }
  0xab   : > { %s1994_s1 = sshll.u32 %s2744_s29, 4  ;;  %s3080_s7 = sld [smem:[#allocation30_spill]] }
  0xac   : > { %s3081_s26 = sld [smem:[#allocation31_spill]]  ;;  %s3082_s24 = sld [smem:[#allocation32_spill]] }
  0xad   : > { %s820_s9 = scalar_lea.vmem %s3071_s8, %s1994_s1  ;;  %s713_s10 = scalar_lea.vmem [#allocation8], %s2735_s18 }
  0xae   : > { %s2757_s21 = scalar_lea.vmem %s3072_s4, %s1994_s1  ;;  %s2766_s11 = scalar_lea.vmem %s3073_s16, %s1994_s1 }
  0xaf   : > { %s3078_s1 = sld [smem:[#allocation28_spill]]  ;;  %s1997_s16 = sshll.u32 %s2744_s29, 5 }
  0xb0   : > { %s839_s2 = scalar_lea.vmem %s3074_s23, %s2744_s29  ;;  %s2792_s23 = scalar_lea.vmem %s3079_s17, %s1997_s16 }
  0xb1   : > { %s859_s8 = scalar_lea.vmem %s3080_s7, %s2744_s29  ;;  %p3083_p6 = scmp.ne.s32.totalorder %s2544_s0, 0 }
  0xb2   : > { %s862_s30 = scalar_lea.vmem %s3081_s26, %s2744_s29  ;;  %s865_s13 = scalar_lea.vmem %s3082_s24, %s2744_s29  ;;  %v871_v0 = vld [vmem:[#allocation2] sm:$0xff] (!%p3083_p6)  ;;  %vm873_vm0 = vcmask (!%p3083_p6), 261120   ;;  %v872_v1 = vld [vmem:[#allocation2 + $0x8] sm:$0xff] (!%p3083_p6) }
  0xb3   : > { %870 = sbr.rel (%p3083_p6) target bundleno = 186 (0xba), region = 112  ;;  %874 = vst.msk [vmem:[#allocation9] sm:$0xff] (!%p3083_p6), %vm873_vm0, %v871_v0  ;;  %875 = vst.msk [vmem:[#allocation9 + $0x8] sm:$0xff] (!%p3083_p6), %vm873_vm0, %v872_v1 }
  0xb5   : > { %s851_s27 = scalar_lea.vmem %s3078_s1, %s2744_s29 }
  0xba PF: > { %v2188_v2 = vld [vmem:[%s820_s9] sm:$0xff]   ;;  %v2424_v3 = vmov 0.0   ;;  %v2189_v4 = vld [vmem:[%s820_s9 + $0x8] sm:$0xff]   ;;  %vm2425_vm1 = vmmov 0   ;;  %vm902_vm2 = vcmask 261120   ;;  %s3085_s16 = scalar_lea.vmem %s2997_s5, %s2744_s29  ;;  %vm1080_vm3 = vcmask 130048  }
  0xbb   : > { %2027 = vmatprep.subr.bf16.mxu1 %v2424_v3  ;;  %2043 = vmatprep.subr.bf16.mxu0 %v2424_v3  ;;  %v2813_v5 = vld [vmem:[#allocation9] sm:$0xff]  ;;  %v2815_v6 = vld [vmem:[#allocation9 + $0x8] sm:$0xff]  ;;  %s2426_s20 = smov 112   ;;  %v1075_v33 = vld [vmem:[#allocation5] sm:$0xff]  ;;  %s3089_s25 = sld [smem:[#allocation24_spill]]  ;;  %vm1599_vm4 = vcmask 523264  }
  0xbc   : > { %2028 = vmatpush3.bf16.msra.mxu1 %v2188_v2  ;;  %2031 = vmatprep.mubr.msk.bf16.mxu1 %vm2425_vm1, %v2424_v3  ;;  %v2190_v7 = vld [vmem:[%s2757_s21] sm:$0xff]   ;;  %v878_v8 = vpack.c.bf16 %v2815_v6, %v2813_v5  ;;  %v2191_v9 = vld [vmem:[%s2757_s21 + $0x8] sm:$0xff]   ;;  %s3084_s21 = scalar_lea.vmem %s2995_s3, %s2744_s29  ;;  %v1076_v37 = vld [vmem:[#allocation5 + $0x8] sm:$0xff]  ;;  %s3091_s15 = sld [smem:[#allocation25_spill]] }
  0xbd   : > { %2029 = vmatprep.subr.bf16.mxu1 %v2424_v3  ;;  %2047 = vmatprep.mubr.msk.bf16.mxu0 %vm2425_vm1, %v2424_v3  ;;  %v1953_v10 = vld [vmem:[%s3084_s21] ss:$0 sm:$0xff]  ;;  %v2193_v28 = vld [vmem:[%s2766_s11 + $0x8] sm:$0xff]   ;;  %s3093_s9 = sld [smem:[#allocation26_spill]]  ;;  %s2427_s7 = smov [#allocation9]  }
  0xbe   : > { %v1957_v18 = vld [vmem:[%s3085_s16] ss:$0 sm:$0xff]  ;;  %s1698_s19 = sshll.u32 %s2427_s7, 4  ;;  %p2142_p0 = scmp.eq.s32.totalorder %s2544_s0, 1  ;;  %s1699_s19 = int_to_ptr.vmem [resolvable:$true] %s1698_s19 }
  0xbf   : > { %v2192_v27 = vld [vmem:[%s2766_s11] sm:$0xff]   ;;  %p2349_p11 = scmp.lt.s32.totalorder %s1699_s19, %s1699_s19 }
  0xc0   : > { %2030 = vmatpush3.bf16.msra.mxu1 %v2189_v4  ;;  %2044 = vmatpush3.bf16.msra.mxu0 %v2192_v27  ;;  %v1961_v4 = vld [vmem:[%s839_s2] ss:$0 sm:$0xff]  ;;  %s3087_s2 = scalar_lea.vmem [#allocation7], %s2735_s18 }
  0xc1   : > { %2035 = vmatprep.subr.bf16.mxu1 %v2424_v3  ;;  %2045 = vmatprep.subr.bf16.mxu0 %v2424_v3  ;;  %s3088_s6 = smov %s3087_s2  ;;  %s3090_s26 = scalar_lea.vmem %s3089_s25, %s2744_s29 }
  0xc2   : > { %s3092_s24 = scalar_lea.vmem %s3091_s15, %s2744_s29 }
  0xc3   : > { %2032 = vmatmul.mubr.msk.bf16.vlgmr.msra.gmra.mrb[0].mxu1 %vm902_vm2, %v878_v8  ;;  %s3094_s21 = scalar_lea.vmem %s3093_s9, %s2744_s29 }
  0xc4   : > { %2036 = vmatpush3.bf16.msra.mxu1 %v2190_v7  ;;  %2039 = vmatprep.mubr.msk.bf16.mxu1 %vm2425_vm1, %v2424_v3 }
  0xc5   : > { %2037 = vmatprep.subr.bf16.mxu1 %v2424_v3  ;;  %2046 = vmatpush3.bf16.msra.mxu0 %v2193_v28  ;;  %v2195_v28 = vld [vmem:[%s3087_s2 + $0x8] sm:$0xff]  }
  0xc6   : > { %2057 = vmatprep.subr.bf16.mxu0 %v2424_v3 }
  0xc8   : > { %2038 = vmatpush3.bf16.msra.mxu1 %v2191_v9  ;;  %2048 = vmatmul.mubr.msk.bf16.vlgmr.msra.gmra.mrb[0].mxu0 %vm902_vm2, %v878_v8 }
  0xc9   : > { %2051 = vmatprep.subr.bf16.mxu1 %v2424_v3  ;;  %2059 = vmatprep.mubr.msk.bf16.mxu0 %vm2425_vm1, %v2424_v3 }
  0xcb   : > { %2040 = vmatmul.mubr.msk.bf16.vlgmr.msra.gmra.mrb[4].mxu1 %vm902_vm2, %v878_v8 }
  0xcc   : > { %2053 = vmatprep.mubr.msk.bf16.mxu1 %vm2425_vm1, %v2424_v3 }
 0x196   : > { %v940_v11 = vpop.f32.mrb[0].mxu1 }
 0x197   : > { %v2033_v12 = vpop.f32.mrb[1].mxu1  ;;  %v941_v14 = vadd.f32 %v1953_v10, %v940_v11 }
 0x198   : > { %v943_v13 = vpop.f32.mrb[2].mxu1 }
 0x199   : > { %v944_v15 = vadd.f32 %v1953_v10, %v943_v13  ;;  %v2034_v16 = vpop.f32.mrb[3].mxu1 }
 0x19b   : > { %v1077_v17 = vpack.c.bf16 %v944_v15, %v941_v14  ;;  %v1068_v0 = vpop.f32.mrb[0].mxu0 }
 0x19c   : > { %v2049_v1 = vpop.f32.mrb[1].mxu0  ;;  %v1069_v8 = vadd.f32 %v1961_v4, %v1068_v0 }
 0x19d   : > { %v1071_v2 = vpop.f32.mrb[2].mxu0 }
 0x19e   : > { %v1004_v19 = vpop.f32.mrb[4].mxu1  ;;  %v2050_v7 = vpop.f32.mrb[3].mxu0  ;;  %v1072_v9 = vadd.f32 %v1961_v4, %v1071_v2 }
 0x19f   : > { %v2041_v20 = vpop.f32.mrb[5].mxu1  ;;  %v1005_v22 = vadd.f32 %v1957_v18, %v1004_v19 }
 0x1a0   : > { %v1007_v21 = vpop.f32.mrb[6].mxu1  ;;  %v1079_v10 = vpack.c.bf16 %v1072_v9, %v1069_v8 }
 0x1a1   : > { %v1008_v23 = vadd.f32 %v1957_v18, %v1007_v21  ;;  %v2042_v24 = vpop.f32.mrb[7].mxu1 }
 0x1a2   : > { %2058 = vmatpush3.bf16.msra.mxu0 %v1079_v10 }
 0x1a3   : > { %v1078_v25 = vpack.c.bf16 %v1008_v23, %v1005_v22  ;;  %2069 = vmatprep.subr.bf16.mxu0 %v2424_v3 }
 0x1a5   : > { %1206 = vrot.lane.b32.xlu0 %v1078_v25, %s2426_s20  ;;  %v1085_v26 = vsel %vm1080_vm3, %v1078_v25, 0 }
 0x1a6   : > { %2052 = vmatpush3.bf16.xpose.msra.mxu1 %v1085_v26 }
 0x1a7   : > { %2063 = vmatprep.subr.bf16.mxu1 %v2424_v3 }
 0x1a9   : > { %1203 = vrot.lane.b32.xlu0 %v1077_v17, %s2426_s20 }
 0x1ad   : > { %2054 = vmatmul.mubr.msk.bf16.vlgmr.msra.gmra.mrb[8].mxu1 %vm1080_vm3, %v1077_v17 }
 0x1ae   : > { %2065 = vmatprep.mubr.msk.bf16.mxu1 %vm2425_vm1, %v2424_v3 }
 0x217   : > { %v1207_v29 = vpop.permute.xlu0 %1206 }
 0x218   : > { %v1212_v30 = vsel %vm1080_vm3, %v1207_v29, 0 }
 0x219   : > { %2064 = vmatpush3.bf16.xpose.msra.mxu1 %v1212_v30 }
 0x21a   : > { %2075 = vmatprep.subr.bf16.mxu1 %v2424_v3 }
 0x21b   : > { %v1204_v31 = vpop.permute.xlu0 %1203 }
 0x220   : > { %2066 = vmatmul.mubr.msk.bf16.vlgmr.msra.gmra.mrb[12].mxu1 %vm1080_vm3, %v1204_v31 }
 0x221   : > { %2077 = vmatprep.mubr.msk.bf16.mxu1 %vm2425_vm1, %v2424_v3  ;;  %2076 = vmatpush3.bf16.msra.mxu1 %v2195_v28  ;;  %v1975_v28 = vld [vmem:[%s3094_s21] ss:$0 sm:$0xff] }
 0x222   : > { %2087 = vmatprep.subr.bf16.mxu1 %v2424_v3 }
 0x280   : > { %v1121_v32 = vpop.f32.mrb[8].mxu1 }
 0x281   : > { %v1128_v34 = vmul.f32 0.25, %v1121_v32  ;;  %v2055_v35 = vpop.f32.mrb[9].mxu1 }
 0x282   : > { %v1124_v36 = vpop.f32.mrb[10].mxu1 }
 0x283   : > { %v1129_v38 = vmul.f32 0.25, %v1124_v36  ;;  %v2056_v39 = vpop.f32.mrb[11].mxu1  ;;  %v1130_v40 = vadd.f32 %v1128_v34, %v1075_v33  ;;  %v2194_v36 = vld [vmem:[%s3088_s6] sm:$0xff]  }
 0x285   : > { %v1132_v41 = vsel %vm1080_vm3, %v1130_v40, -inf  ;;  %v1131_v42 = vadd.f32 %v1129_v38, %v1076_v37 }
 0x286   : > { %1133 = vmax.xlane.f32.xlu1 %v1132_v41 }
 0x287   : > { %v1135_v43 = vsel %vm1080_vm3, %v1131_v42, -inf }
 0x28a   : > { %1136 = vmax.xlane.f32.xlu1 %v1135_v43 }
 0x2f3   : > { %v1248_v44 = vpop.f32.mrb[12].mxu1 }
 0x2f4   : > { %v1255_v45 = vmul.f32 0.25, %v1248_v44  ;;  %v2067_v46 = vpop.f32.mrb[13].mxu1 }
 0x2f5   : > { %v1251_v47 = vpop.f32.mrb[14].mxu1 }
 0x2f6   : > { %v1256_v48 = vmul.f32 0.25, %v1251_v47  ;;  %v2068_v49 = vpop.f32.mrb[15].mxu1  ;;  %v1257_v50 = vadd.f32 %v1255_v45, %v1075_v33 }
 0x2f8   : > { %v1259_v51 = vsel %vm1080_vm3, %v1257_v50, -inf  ;;  %v1258_v52 = vadd.f32 %v1256_v48, %v1076_v37 }
 0x2f9   : > { %1260 = vmax.xlane.f32.xlu0 %v1259_v51 }
 0x2fa   : > { %v1262_v53 = vsel %vm1080_vm3, %v1258_v52, -inf }
 0x2fb   : > { %1263 = vmax.xlane.f32.xlu1 %v1262_v53  ;;  %v1973_v53 = vld [vmem:[%s3090_s26] ss:$0 sm:$0xff] }
 0x313   : > { %v1134_v54 = vpop.xlane.xlu1 %1133 }
 0x314   : > { %v1138_v55 = vsub.f32 %v1130_v40, %v1134_v54 }
 0x316   : > { %v1140_v56 = vmul.f32 1.442695, %v1138_v55 }
 0x317   : > { %v1137_v57 = vpop.xlane.xlu1 %1136 }
 0x318   : > { %2202 = vpow2.f32 %v1140_v56  ;;  %v1139_v58 = vsub.f32 %v1131_v42, %v1137_v57 }
 0x31a   : > { %v1142_v59 = vmul.f32 1.442695, %v1139_v58 }
 0x31c   : > { %2204 = vpow2.f32 %v1142_v59 }
 0x322   : > { %v2203_v60 = vpop.eup %2202 }
 0x323   : > { %v1144_v61 = vsel %vm1080_vm3, %v2203_v60, 0.0 }
 0x324   : > { %1145 = vadd.xlane.f32.xlu1 %v1144_v61 }
 0x326   : > { %v2205_v62 = vpop.eup %2204 }
 0x327   : > { %v1147_v63 = vsel %vm1080_vm3, %v2205_v62, 0.0 }
 0x328   : > { %1148 = vadd.xlane.f32.xlu1 %v1147_v63 }
 0x386   : > { %v1261_v11 = vpop.xlane.xlu0 %1260 }
 0x387   : > { %v1265_v12 = vsub.f32 %v1257_v50, %v1261_v11 }
 0x388   : > { %v1264_v13 = vpop.xlane.xlu1 %1263 }
 0x389   : > { %v1267_v14 = vmul.f32 1.442695, %v1265_v12  ;;  %v1266_v15 = vsub.f32 %v1258_v52, %v1264_v13  ;;  %v2196_v12 = vld [vmem:[%s713_s10] sm:$0xff]   ;;  %v2197_v13 = vld [vmem:[%s713_s10 + $0x8] sm:$0xff]  }
 0x38b   : > { %2206 = vpow2.f32 %v1267_v14  ;;  %v1269_v16 = vmul.f32 1.442695, %v1266_v15  ;;  %v2198_v14 = vld [vmem:[%s2792_s23] sm:$0xff]   ;;  %v2199_v15 = vld [vmem:[%s2792_s23 + $0x8] sm:$0xff]  }
 0x38d   : > { %2208 = vpow2.f32 %v1269_v16 }
 0x395   : > { %v2207_v17 = vpop.eup %2206 }
 0x396   : > { %v1271_v18 = vsel %vm1080_vm3, %v2207_v17, 0.0 }
 0x397   : > { %v2209_v19 = vpop.eup %2208  ;;  %1272 = vadd.xlane.f32.xlu1 %v1271_v18 }
 0x398   : > { %v1274_v20 = vsel %vm1080_vm3, %v2209_v19, 0.0 }
 0x39b   : > { %1275 = vadd.xlane.f32.xlu1 %v1274_v20 }
 0x3ac   : > { %1283 = vrot.lane.b32.xlu1 %v1079_v10, %s2426_s20 }
 0x3b1   : > { %v1146_v21 = vpop.xlane.xlu1 %1145 }
 0x3b2   : > { %2210 = vrcp.f32 %v1146_v21 }
 0x3b5   : > { %v1149_v22 = vpop.xlane.xlu1 %1148 }
 0x3b6   : > { %2212 = vrcp.f32 %v1149_v22 }
 0x3bc   : > { %v2211_v23 = vpop.eup %2210 }
 0x3bd   : > { %v1152_v25 = vmul.f32 %v2211_v23, %v2203_v60 }
 0x3c0   : > { %v2213_v24 = vpop.eup %2212 }
 0x3c1   : > { %v1153_v26 = vmul.f32 %v2213_v24, %v2205_v62  ;;  %v1974_v24 = vld [vmem:[%s3092_s24] ss:$0 sm:$0xff] }
 0x3c3   : > { %v1154_v27 = vpack.c.bf16 %v1153_v26, %v1152_v25 }
 0x3c5   : > { %2060 = vmatmul.mubr.msk.bf16.vlgmr.msra.gmra.mrb[4].mxu0 %vm1080_vm3, %v1154_v27 }
 0x3c6   : > { %2071 = vmatprep.mubr.msk.bf16.mxu0 %vm2425_vm1, %v2424_v3 }
 0x424   : > { %v1273_v29 = vpop.xlane.xlu1 %1272 }
 0x425   : > { %2214 = vrcp.f32 %v1273_v29 }
 0x428   : > { %v1276_v30 = vpop.xlane.xlu1 %1275 }
 0x429   : > { %2216 = vrcp.f32 %v1276_v30 }
 0x42c   : > { %v1284_v31 = vpop.permute.xlu1 %1283 }
 0x42d   : > { %2070 = vmatpush3.bf16.msra.mxu0 %v1284_v31 }
 0x42e   : > { %2081 = vmatprep.subr.bf16.mxu0 %v2424_v3 }
 0x42f   : > { %v2215_v32 = vpop.eup %2214 }
 0x430   : > { %v1279_v34 = vmul.f32 %v2215_v32, %v2207_v17 }
 0x433   : > { %v2217_v33 = vpop.eup %2216 }
 0x434   : > { %v1280_v35 = vmul.f32 %v2217_v33, %v2209_v19  ;;  %v2200_v33 = vld [vmem:[%s2792_s23 + $0x10] sm:$0xff]  }
 0x436   : > { %v1281_v37 = vpack.c.bf16 %v1280_v35, %v1279_v34  ;;  %v2201_v34 = vld [vmem:[%s2792_s23 + $0x18] sm:$0xff]   ;;  %v1976_v35 = vld [vmem:[%s851_s27] ss:$0 sm:$0xff] }
 0x438   : > { %2072 = vmatmul.mubr.msk.bf16.vlgmr.msra.gmra.mrb[8].mxu0 %vm1080_vm3, %v1281_v37 }
 0x439   : > { %2082 = vmatpush3.bf16.msra.mxu0 %v2194_v36  ;;  %2083 = vmatprep.mubr.msk.bf16.mxu0 %vm2425_vm1, %v2424_v3 }
 0x43a   : > { %2095 = vmatprep.subr.bf16.mxu0 %v2424_v3 }
 0x498   : > { %v1192_v38 = vpop.f32.mrb[4].mxu0 }
 0x499   : > { %v2061_v39 = vpop.f32.mrb[5].mxu0 }
 0x49a   : > { %v1195_v40 = vpop.f32.mrb[6].mxu0 }
 0x49b   : > { %v1199_v41 = vpack.c.bf16 %v1195_v40, %v1192_v38  ;;  %v2062_v42 = vpop.f32.mrb[7].mxu0 }
 0x49d   : > { %2084 = vmatmul.mubr.msk.bf16.vlgmr.msra.gmra.mrb[12].mxu0 %vm1080_vm3, %v1199_v41 }
 0x49e   : > { %2103 = vmatprep.mubr.msk.bf16.mxu0 %vm2425_vm1, %v2424_v3  ;;  %2096 = vmatpush3.bf16.msra.mxu0 %v2198_v14 }
 0x49f   : > { %2097 = vmatprep.subr.bf16.mxu0 %v2424_v3 }
 0x4a2   : > { %2098 = vmatpush3.bf16.msra.mxu0 %v2199_v15 }
 0x4a3   : > { %2099 = vmatprep.subr.bf16.mxu0 %v2424_v3 }
 0x4a6   : > { %2100 = vmatpush3.bf16.msra.mxu0 %v2200_v33 }
 0x4a7   : > { %2101 = vmatprep.subr.bf16.mxu0 %v2424_v3 }
 0x4aa   : > { %2102 = vmatpush3.bf16.msra.mxu0 %v2201_v34 }
 0x50b   : > { %v1323_v43 = vpop.f32.mrb[8].mxu0 }
 0x50c   : > { %v2073_v44 = vpop.f32.mrb[9].mxu0 }
 0x50d   : > { %v1326_v45 = vpop.f32.mrb[10].mxu0 }
 0x50e   : > { %v1330_v46 = vpack.c.bf16 %v1326_v45, %v1323_v43  ;;  %v2074_v47 = vpop.f32.mrb[11].mxu0 }
 0x510   : > { %2078 = vmatmul.mubr.msk.bf16.vlgmr.msra.gmra.mrb[16].mxu1 %vm1080_vm3, %v1330_v46 }
 0x511   : > { %2091 = vmatprep.mubr.msk.bf16.mxu1 %vm2425_vm1, %v2424_v3  ;;  %2088 = vmatpush3.bf16.msra.mxu1 %v2196_v12 }
 0x512   : > { %2089 = vmatprep.subr.bf16.mxu1 %v2424_v3  ;;  %v1980_v3 = vld [vmem:[%s859_s8] ss:$0 sm:$0xff] }
 0x515   : > { %2090 = vmatpush3.bf16.msra.mxu1 %v2197_v13 }
 0x570   : > { %v1426_v48 = vpop.f32.mrb[12].mxu0 }
 0x571   : > { %v2085_v49 = vpop.f32.mrb[13].mxu0 }
 0x572   : > { %v1429_v50 = vpop.f32.mrb[14].mxu0 }
 0x573   : > { %v2086_v51 = vpop.f32.mrb[15].mxu0 }
 0x5e3   : > { %v1376_v52 = vpop.f32.mrb[16].mxu1 }
 0x5e4   : > { %v1427_v54 = vadd.f32 %v1426_v48, %v1376_v52  ;;  %v2079_v55 = vpop.f32.mrb[17].mxu1 }
 0x5e5   : > { %v1379_v56 = vpop.f32.mrb[18].mxu1 }
 0x5e6   : > { %v1440_v57 = vadd.f32 %v1973_v53, %v1427_v54  ;;  %v1430_v58 = vadd.f32 %v1429_v50, %v1379_v56  ;;  %v2080_v59 = vpop.f32.mrb[19].mxu1 }
 0x5e8   : > { %v1441_v60 = vadd.f32 %v1973_v53, %v1430_v58  ;;  %v1442_v61 = vadd.f32 %v1440_v57, %v2813_v5 }
 0x5ea   : > { %v1446_v62 = vsel %vm902_vm2, %v1442_v61, 0.0  ;;  %v1443_v63 = vadd.f32 %v1441_v60, %v2815_v6 }
 0x5eb   : > { %1447 = vadd.xlane.f32.xlu0 %v1446_v62 }
 0x5ec   : > { %v1449_v0 = vsel %vm902_vm2, %v1443_v63, 0.0 }
 0x5ef   : > { %1450 = vadd.xlane.f32.xlu0 %v1449_v0 }
 0x678   : > { %v1448_v1 = vpop.xlane.xlu0 %1447 }
 0x679   : > { %v1453_v2 = vmul.f32 0.03125, %v1448_v1 }
 0x67b   : > { %v1455_v4 = vsub.f32 %v1442_v61, %v1453_v2 }
 0x67c   : > { %v1451_v7 = vpop.xlane.xlu0 %1450 }
 0x67d   : > { %v1454_v8 = vmul.f32 0.03125, %v1451_v7  ;;  %v1457_v9 = vmul.f32 %v1455_v4, %v1455_v4 }
 0x67f   : > { %v1456_v10 = vsub.f32 %v1443_v63, %v1454_v8  ;;  %v1459_v5 = vsel %vm902_vm2, %v1457_v9, 0.0 }
 0x680   : > { %1460 = vadd.xlane.f32.xlu1 %v1459_v5  ;;  %v1986_v5 = vld [vmem:[%s862_s30] ss:$0 sm:$0xff]  ;;  %s2342_s30 = scalar_lea.vmem %s1699_s19, 256 }
 0x681   : > { %v1458_v11 = vmul.f32 %v1456_v10, %v1456_v10  ;;  %p2343_p9 = scmp.ne.s32.totalorder %s1699_s19, %s2342_s30  ;;  %p2350_p13 = scmp.lt.s32.totalorder %s2342_s30, %s2342_s30 }
 0x683   : > { %v1462_v6 = vsel %vm902_vm2, %v1458_v11, 0.0  ;;  %p2344_p2 = pnand %p2343_p9, %p2142_p0  ;;  %p2351_p7 = por %p2350_p13, %p2349_p11 }
 0x684   : > { %1463 = vadd.xlane.f32.xlu0 %v1462_v6  ;;  %v1987_v6 = vld [vmem:[%s865_s13] ss:$0 sm:$0xff] }
 0x685   : > { %p2345_p4 = pneg %p2344_p2 }
 0x687   : > { %p2352_p5 = pnand %p2351_p7, %p2345_p4 }
 0x70d   : > { %v1461_v16 = vpop.xlane.xlu1 %1460 }
 0x70e   : > { %v1465_v17 = vmul.f32 0.03125, %v1461_v16 }
 0x710   : > { %v1467_v18 = vadd.f32 1e-05, %v1465_v17 }
 0x711   : > { %v1464_v19 = vpop.xlane.xlu0 %1463 }
 0x712   : > { %2218 = vrsqrt.f32 %v1467_v18  ;;  %v1466_v20 = vmul.f32 0.03125, %v1464_v19 }
 0x714   : > { %v1468_v21 = vadd.f32 1e-05, %v1466_v20 }
 0x716   : > { %2220 = vrsqrt.f32 %v1468_v21 }
 0x71c   : > { %v2219_v22 = vpop.eup %2218 }
 0x71d   : > { %v1471_v23 = vmul.f32 %v2219_v22, %v1455_v4 }
 0x71f   : > { %v1479_v26 = vmul.f32 %v1974_v24, %v1471_v23 }
 0x720   : > { %v2221_v25 = vpop.eup %2220 }
 0x721   : > { %v1472_v27 = vmul.f32 %v2221_v25, %v1456_v10  ;;  %v1487_v30 = vadd.f32 %v1975_v28, %v1479_v26 }
 0x723   : > { %v1480_v29 = vmul.f32 %v1974_v24, %v1472_v27 }
 0x725   : > { %v1488_v31 = vadd.f32 %v1975_v28, %v1480_v29 }
 0x727   : > { %v1489_v32 = vpack.c.bf16 %v1488_v31, %v1487_v30 }
 0x729   : > { %2092 = vmatmul.mubr.msk.bf16.vlgmr.msra.gmra.mrb[20].mxu1 %vm902_vm2, %v1489_v32 }
 0x7fc   : > { %v1550_v36 = vpop.f32.mrb[20].mxu1 }
 0x7fd   : > { %v1551_v37 = vadd.f32 %v1976_v35, %v1550_v36  ;;  %v2093_v38 = vpop.f32.mrb[21].mxu1 }
 0x7fe   : > { %v1553_v39 = vpop.f32.mrb[22].mxu1 }
 0x7ff   : > { %v1554_v40 = vadd.f32 %v1976_v35, %v1553_v39  ;;  %v2094_v41 = vpop.f32.mrb[23].mxu1  ;;  %v1557_v42 = vmax.f32 %v1551_v37, 0.0 }
 0x801   : > { %v1558_v43 = vmax.f32 %v1554_v40, 0.0 }
 0x803   : > { %v1559_v44 = vpack.c.bf16 %v1558_v43, %v1557_v42 }
 0x805   : > { %2104 = vmatmul.mubr.msk.bf16.vlgmr.msra.gmra.mrb[16].mxu0 %vm1599_vm4, %v1559_v44 }
 0x8d8   : > { %v1637_v45 = vpop.f32.mrb[16].mxu0 }
 0x8d9   : > { %v1638_v46 = vadd.f32 %v1980_v3, %v1637_v45  ;;  %v2105_v47 = vpop.f32.mrb[17].mxu0 }
 0x8da   : > { %v1640_v48 = vpop.f32.mrb[18].mxu0 }
 0x8db   : > { %v1641_v49 = vadd.f32 %v1980_v3, %v1640_v48  ;;  %v2106_v50 = vpop.f32.mrb[19].mxu0  ;;  %v1644_v51 = vadd.f32 %v1638_v46, %v1487_v30 }
 0x8dd   : > { %v1648_v52 = vsel %vm902_vm2, %v1644_v51, 0.0  ;;  %v1645_v53 = vadd.f32 %v1641_v49, %v1488_v31 }
 0x8de   : > { %1649 = vadd.xlane.f32.xlu0 %v1648_v52 }
 0x8df   : > { %v1651_v54 = vsel %vm902_vm2, %v1645_v53, 0.0 }
 0x8e2   : > { %1652 = vadd.xlane.f32.xlu0 %v1651_v54 }
 0x96b   : > { %v1650_v55 = vpop.xlane.xlu0 %1649 }
 0x96c   : > { %v1654_v56 = vmul.f32 0.03125, %v1650_v55 }
 0x96e   : > { %v1656_v57 = vsub.f32 %v1644_v51, %v1654_v56 }
 0x96f   : > { %v1653_v58 = vpop.xlane.xlu0 %1652 }
 0x970   : > { %v1655_v59 = vmul.f32 0.03125, %v1653_v58  ;;  %v1658_v60 = vmul.f32 %v1656_v57, %v1656_v57 }
 0x972   : > { %v1657_v61 = vsub.f32 %v1645_v53, %v1655_v59  ;;  %v1660_v62 = vsel %vm902_vm2, %v1658_v60, 0.0 }
 0x973   : > { %1661 = vadd.xlane.f32.xlu0 %v1660_v62 }
 0x974   : > { %v1659_v63 = vmul.f32 %v1657_v61, %v1657_v61 }
 0x976   : > { %v1663_v0 = vsel %vm902_vm2, %v1659_v63, 0.0 }
 0x977   : > { %1664 = vadd.xlane.f32.xlu0 %v1663_v0 }
 0xa00   : > { %v1662_v1 = vpop.xlane.xlu0 %1661 }
 0xa01   : > { %v1666_v2 = vmul.f32 0.03125, %v1662_v1 }
 0xa03   : > { %v1668_v4 = vadd.f32 1e-05, %v1666_v2 }
 0xa04   : > { %v1665_v7 = vpop.xlane.xlu0 %1664 }
 0xa05   : > { %2222 = vrsqrt.f32 %v1668_v4  ;;  %v1667_v8 = vmul.f32 0.03125, %v1665_v7 }
 0xa07   : > { %v1669_v9 = vadd.f32 1e-05, %v1667_v8 }
 0xa09   : > { %2224 = vrsqrt.f32 %v1669_v9 }
 0xa0f   : > { %v2223_v10 = vpop.eup %2222 }
 0xa10   : > { %v1672_v11 = vmul.f32 %v2223_v10, %v1656_v57 }
 0xa12   : > { %v1680_v12 = vmul.f32 %v1986_v5, %v1672_v11 }
 0xa13   : > { %v2225_v13 = vpop.eup %2224 }
 0xa14   : > { %v1673_v14 = vmul.f32 %v2225_v13, %v1657_v61  ;;  %v1688_v15 = vadd.f32 %v1987_v6, %v1680_v12 }
 0xa16   : > { %v1681_v16 = vmul.f32 %v1986_v5, %v1673_v14  ;;  %1690 = vst.msk [vmem:[#allocation9] sm:$0xff] %vm902_vm2, %v1688_v15 }
 0xa18   : > { %v1689_v17 = vadd.f32 %v1987_v6, %v1681_v16 }
 0xa1a   : > { %1691 = vst.msk [vmem:[#allocation9 + $0x8] sm:$0xff] %vm902_vm2, %v1689_v17 }
 0xa1b   : > { %2355 = shalt.err (!%p2352_p5)
}
 0xa1c   : > { %s3099_s25 = sld [smem:[#allocation33_spill]] }
 0xa22   : > { %s2356_s26 = scalar_lea.hbm %s3099_s25, 256 }
 0xa23   : > { %p2357_p10 = scmp.ne.s32.totalorder %s3099_s25, %s2356_s26  ;;  %p2362_p8 = scmp.lt.u32.totalorder %s2356_s26, %s3099_s25 }
 0xa25   : > { %p2358_p12 = pnand %p2357_p10, %p2142_p0 }
 0xa27   : > { %p2359_p1 = pneg %p2358_p12 }
 0xa29   : > { %p2364_p3 = pnand %p2362_p8, %p2359_p1 }
 0xa2b   : > { %2367 = shalt.err (!%p2364_p3)
}
 0xa2c   : > { %s2428_s10 = smov 128   ;;  %s2429_s12 = smov 8  }
 0xa2d   : > { %2120 = dma.vmem_to_hbm [thread:$0]  (%p2142_p0), %s1699_s19, 256, %s3099_s25, [#allocation4], %s2428_s10, %s2428_s10, %s2429_s12  }
 0xa2e   : > { %2397 = dma.done.wait (%p2142_p0), [#allocation4], 256  }
 0xa2f   : > { %2399 = vsyncadd (%p2142_p0), [#allocation4], 4294967040 }
 0xa30 PF: > { %s3100_s30 = sld [smem:[#allocation15_spill]]  ;;  %s3101_s22 = sld [smem:[#allocation14_spill]] }
 0xa31   : > { %s3102_s29 = sld [smem:[#allocation16_spill]]  ;;  %s3103_s27 = smov %s2406_s28 }
 0xa36   : > { %p28_p6 = scmp.ge.s32.totalorder %s3100_s30, 4   ;;  %s3104_s28 = smov %s3101_s22 }
 0xa38   :  { %30 = sbr.rel (!%p28_p6) target bundleno = 22 (0x16), region = 193 }
 0xa3f   :  { %1714 = vsyncpa [#allocation3], 1 }
 0xa40   :  { %1716 = vsyncpa [#allocation3 + $0x1], 1 }
 0xa41   :  { %1717 = vsyncpa [#allocation6], 1 }
 0xa42   :  { %1718 = vsyncpa [#allocation4], 1 }
 0xa43   :  { %1720 = vsyncpa [#allocation4 + $0x1], 1 }

</bundles_post_ra>
